<compile_context>
chip_gen: v7x
topology: tpu7x:2x2x1
jax: 0.10.0
libtpu: 0.0.40
codegen_flags: <defaults>
</compile_context>

<pallas_src>
import jax
import jax.numpy as jnp
from jax.experimental import pallas as pl
from jax.experimental.pallas import tpu as pltpu

INPUT_DIM = 784
HIDDEN_DIM = 400
LATENT_DIM = 20
MAX_TB = 256  # max batch rows per grid step


def _vae_kernel(x_ref, eps_ref,
                w1_ref, b1_ref,
                wh_ref, bh_ref,
                w3_ref, b3_ref,
                w4_ref, b4_ref,
                recon_ref, mu_ref, logvar_ref):
    # encode: h1 = relu(x @ W1 + b1)    (bf16 matmul, f32 accumulate)
    x = x_ref[...]
    h1 = jnp.dot(x.astype(jnp.bfloat16), w1_ref[...],
                 preferred_element_type=jnp.float32) + b1_ref[...]
    h1 = jnp.maximum(h1, 0.0)

    # fused mu/logvar heads: one (TB, 40) matmul, sliced in-kernel for reparam
    heads = jnp.dot(h1.astype(jnp.bfloat16), wh_ref[...],
                    preferred_element_type=jnp.float32) + bh_ref[...]
    mu = heads[:, :LATENT_DIM]
    logvar = heads[:, LATENT_DIM:]

    # reparameterize (f32): z = mu + eps * exp(0.5 * logvar)
    z = mu + eps_ref[...] * jnp.exp(0.5 * logvar)

    # decode: h3 = relu(z @ W3 + b3); recon = sigmoid(h3 @ W4 + b4)
    h3 = jnp.dot(z.astype(jnp.bfloat16), w3_ref[...],
                 preferred_element_type=jnp.float32) + b3_ref[...]
    h3 = jnp.maximum(h3, 0.0)
    logits = jnp.dot(h3.astype(jnp.bfloat16), w4_ref[...],
                     preferred_element_type=jnp.float32) + b4_ref[...]

    recon_ref[...] = jax.nn.sigmoid(logits).astype(recon_ref.dtype)
    mu_ref[...] = mu.astype(mu_ref.dtype)
    logvar_ref[...] = logvar.astype(logvar_ref.dtype)


def prepare_params(params):
    """Convert f32 master params to kernel layout: bf16 weights, fused heads."""
    return {
        "w1": params["w1"].astype(jnp.bfloat16),
        "b1": params["b1"].astype(jnp.float32),
        "w_heads": jnp.concatenate([params["w21"], params["w22"]],
                                   axis=1).astype(jnp.bfloat16),
        "b_heads": jnp.concatenate([params["b21"], params["b22"]],
                                   axis=1).astype(jnp.float32),
        "w3": params["w3"].astype(jnp.bfloat16),
        "b3": params["b3"].astype(jnp.float32),
        "w4": params["w4"].astype(jnp.bfloat16),
        "b4": params["b4"].astype(jnp.float32),
    }


@jax.jit
def vae_forward(x, eps, prep):
    """x: (B, 1, 28, 28) or (B, 784); eps: (B, 20); prep: prepare_params(...)."""
    x2d = x.reshape(-1, INPUT_DIM).astype(jnp.float32)
    eps = eps.astype(jnp.float32)
    B = x2d.shape[0]

    # adaptive batch tile: fill the MXU for big batches, no wasted rows for
    # small ones; batch is zero-padded to a multiple of TB
    TB = min(MAX_TB, ((B + 7) // 8) * 8)
    n_tiles = pl.cdiv(B, TB)
    B_pad = n_tiles * TB
    if B_pad != B:
        x2d = jnp.pad(x2d, ((0, B_pad - B), (0, 0)))
        eps = jnp.pad(eps, ((0, B_pad - B), (0, 0)))

    # batch-tiled activation specs; weights/biases resident across grid steps
    act_spec = lambda d: pl.BlockSpec((TB, d), lambda i: (i, 0))
    res_spec = lambda r, c: pl.BlockSpec((r, c), lambda i: (0, 0))

    in_specs = [
        act_spec(INPUT_DIM),                      # x
        act_spec(LATENT_DIM),                     # eps
        res_spec(INPUT_DIM, HIDDEN_DIM),          # w1
        res_spec(1, HIDDEN_DIM),                  # b1
        res_spec(HIDDEN_DIM, 2 * LATENT_DIM),     # w_heads
        res_spec(1, 2 * LATENT_DIM),              # b_heads
        res_spec(LATENT_DIM, HIDDEN_DIM),         # w3
        res_spec(1, HIDDEN_DIM),                  # b3
        res_spec(HIDDEN_DIM, INPUT_DIM),          # w4
        res_spec(1, INPUT_DIM),                   # b4
    ]
    out_specs = (act_spec(INPUT_DIM),             # recon
                 act_spec(LATENT_DIM),            # mu
                 act_spec(LATENT_DIM))            # logvar

    flops_per_row = 2 * (INPUT_DIM * HIDDEN_DIM + HIDDEN_DIM * 2 * LATENT_DIM
                         + LATENT_DIM * HIDDEN_DIM + HIDDEN_DIM * INPUT_DIM)
    weight_bytes = 2 * (INPUT_DIM * HIDDEN_DIM + HIDDEN_DIM * 2 * LATENT_DIM
                        + LATENT_DIM * HIDDEN_DIM + HIDDEN_DIM * INPUT_DIM)
    act_bytes = 4 * B_pad * (2 * INPUT_DIM + 3 * LATENT_DIM)
    cost = pl.CostEstimate(
        flops=int(flops_per_row * B_pad),
        transcendentals=int(B_pad * (LATENT_DIM + INPUT_DIM)),
        bytes_accessed=int(weight_bytes + act_bytes),
    )

    recon, mu, logvar = pl.pallas_call(
        _vae_kernel,
        grid=(n_tiles,),
        in_specs=in_specs,
        out_specs=out_specs,
        out_shape=(
            jax.ShapeDtypeStruct((B_pad, INPUT_DIM), jnp.float32),
            jax.ShapeDtypeStruct((B_pad, LATENT_DIM), jnp.float32),
            jax.ShapeDtypeStruct((B_pad, LATENT_DIM), jnp.float32),
        ),
        compiler_params=pltpu.CompilerParams(
            dimension_semantics=("parallel",),
            vmem_limit_bytes=32 * 1024 * 1024,
        ),
        cost_estimate=cost,
    )(x2d, eps,
      prep["w1"], prep["b1"],
      prep["w_heads"], prep["b_heads"],
      prep["w3"], prep["b3"],
      prep["w4"], prep["b4"])

    if B_pad != B:
        recon, mu, logvar = recon[:B], mu[:B], logvar[:B]
    return recon, mu, logvar


def init_params(key):
    """PyTorch-style init U(-1/sqrt(fan_in), 1/sqrt(fan_in)); W as (in, out)."""
    def linear(key, fan_in, fan_out):
        kw, kb = jax.random.split(key)
        bound = 1.0 / jnp.sqrt(fan_in)
        w = jax.random.uniform(kw, (fan_in, fan_out), jnp.float32, -bound, bound)
        b = jax.random.uniform(kb, (1, fan_out), jnp.float32, -bound, bound)
        return w, b

    k1, k21, k22, k3, k4 = jax.random.split(key, 5)
    params = {}
    params["w1"], params["b1"] = linear(k1, INPUT_DIM, HIDDEN_DIM)
    params["w21"], params["b21"] = linear(k21, HIDDEN_DIM, LATENT_DIM)
    params["w22"], params["b22"] = linear(k22, HIDDEN_DIM, LATENT_DIM)
    params["w3"], params["b3"] = linear(k3, LATENT_DIM, HIDDEN_DIM)
    params["w4"], params["b4"] = linear(k4, HIDDEN_DIM, INPUT_DIM)
    return params


def _reference_forward(x, eps, prep):
    """Pure-JAX reference using the same bf16 weights / f32 accumulation."""
    x2d = x.reshape(-1, INPUT_DIM).astype(jnp.float32)
    h1 = jnp.dot(x2d.astype(jnp.bfloat16), prep["w1"],
                 preferred_element_type=jnp.float32) + prep["b1"]
    h1 = jnp.maximum(h1, 0.0)
    heads = jnp.dot(h1.astype(jnp.bfloat16), prep["w_heads"],
                    preferred_element_type=jnp.float32) + prep["b_heads"]
    mu, logvar = heads[:, :LATENT_DIM], heads[:, LATENT_DIM:]
    z = mu + eps * jnp.exp(0.5 * logvar)
    h3 = jnp.dot(z.astype(jnp.bfloat16), prep["w3"],
                 preferred_element_type=jnp.float32) + prep["b3"]
    h3 = jnp.maximum(h3, 0.0)
    logits = jnp.dot(h3.astype(jnp.bfloat16), prep["w4"],
                     preferred_element_type=jnp.float32) + prep["b4"]
    return jax.nn.sigmoid(logits), mu, logvar


if __name__ == "__main__":
    key = jax.random.PRNGKey(0)
    kparam, kx, keps = jax.random.split(key, 3)

    params = init_params(kparam)
    prep = prepare_params(params)

    B = 8
    x = jax.random.uniform(kx, (B, 1, 28, 28), jnp.float32)      # MNIST-like input
    eps = jax.random.normal(keps, (B, LATENT_DIM), jnp.float32)  # reparam noise

    recon, mu, logvar = vae_forward(x, eps, prep)
    jax.block_until_ready((recon, mu, logvar))

    # sanity check against a pure-JAX reference with identical bf16 weights
    r_ref, mu_ref, lv_ref = _reference_forward(x, eps, prep)
    assert recon.shape == (B, INPUT_DIM)
    assert mu.shape == (B, LATENT_DIM) and logvar.shape == (B, LATENT_DIM)
    assert jnp.allclose(recon, r_ref, atol=5e-3), float(jnp.abs(recon - r_ref).max())
    assert jnp.allclose(mu, mu_ref, atol=5e-3), float(jnp.abs(mu - mu_ref).max())
    assert jnp.allclose(logvar, lv_ref, atol=5e-3), float(jnp.abs(logvar - lv_ref).max())

    print("KERNEL_OK")
</pallas_src>

<mosaic_0001>
module attributes {stable_mosaic.version = 11 : i64} {
  func.func @_vae_kernel(%arg0: i32, %arg1: memref<8x784xf32, #tpu.memory_space<vmem>>, %arg2: memref<8x20xf32, #tpu.memory_space<vmem>>, %arg3: memref<784x400xbf16, #tpu.memory_space<vmem>>, %arg4: memref<1x400xf32, #tpu.memory_space<vmem>>, %arg5: memref<400x40xbf16, #tpu.memory_space<vmem>>, %arg6: memref<1x40xf32, #tpu.memory_space<vmem>>, %arg7: memref<20x400xbf16, #tpu.memory_space<vmem>>, %arg8: memref<1x400xf32, #tpu.memory_space<vmem>>, %arg9: memref<400x784xbf16, #tpu.memory_space<vmem>>, %arg10: memref<1x784xf32, #tpu.memory_space<vmem>>, %arg11: memref<8x784xf32, #tpu.memory_space<vmem>>, %arg12: memref<8x20xf32, #tpu.memory_space<vmem>>, %arg13: memref<8x20xf32, #tpu.memory_space<vmem>>) attributes {dimension_semantics = [#tpu.dimension_semantics<parallel>], iteration_bounds = array<i64: 1>, scalar_prefetch = 0 : i64, scratch_operands = 0 : i64, tpu.core_type = #tpu.core_type<tc>, window_params = [{transform_indices = @transform_0, window_bounds = array<i64: 8, 784>}, {transform_indices = @transform_1, window_bounds = array<i64: 8, 20>}, {pipeline_mode = #tpu.pipeline_mode<synchronous>, transform_indices = @transform_2, window_bounds = array<i64: 784, 400>}, {pipeline_mode = #tpu.pipeline_mode<synchronous>, transform_indices = @transform_3, window_bounds = array<i64: 1, 400>}, {pipeline_mode = #tpu.pipeline_mode<synchronous>, transform_indices = @transform_4, window_bounds = array<i64: 400, 40>}, {pipeline_mode = #tpu.pipeline_mode<synchronous>, transform_indices = @transform_5, window_bounds = array<i64: 1, 40>}, {pipeline_mode = #tpu.pipeline_mode<synchronous>, transform_indices = @transform_6, window_bounds = array<i64: 20, 400>}, {pipeline_mode = #tpu.pipeline_mode<synchronous>, transform_indices = @transform_7, window_bounds = array<i64: 1, 400>}, {pipeline_mode = #tpu.pipeline_mode<synchronous>, transform_indices = @transform_8, window_bounds = array<i64: 400, 784>}, {pipeline_mode = #tpu.pipeline_mode<synchronous>, transform_indices = @transform_9, window_bounds = array<i64: 1, 784>}, {transform_indices = @transform_10, window_bounds = array<i64: 8, 784>}, {transform_indices = @transform_11, window_bounds = array<i64: 8, 20>}, {transform_indices = @transform_12, window_bounds = array<i64: 8, 20>}]} {
    %c0 = arith.constant 0 : index
    %c0_0 = arith.constant 0 : index
    %0 = vector.load %arg1[%c0, %c0_0] : memref<8x784xf32, #tpu.memory_space<vmem>>, vector<8x784xf32>
    %1 = arith.truncf %0 : vector<8x784xf32> to vector<8x784xbf16>
    %c0_1 = arith.constant 0 : index
    %c0_2 = arith.constant 0 : index
    %2 = vector.load %arg3[%c0_1, %c0_2] : memref<784x400xbf16, #tpu.memory_space<vmem>>, vector<784x400xbf16>
    %cst = arith.constant dense<0.000000e+00> : vector<8x400xf32>
    %3 = tpu.matmul %1, %2, %cst {dimension_numbers = #tpu.dot_dimension_numbers<[1], [0], [0], [1], [0, 0, 1, 1], [], []>} : vector<8x784xbf16>, vector<784x400xbf16>, vector<8x400xf32> -> vector<8x400xf32>
    %c0_3 = arith.constant 0 : index
    %c0_4 = arith.constant 0 : index
    %4 = vector.load %arg4[%c0_3, %c0_4] : memref<1x400xf32, #tpu.memory_space<vmem>>, vector<1x400xf32>
    %5 = vector.broadcast %4 : vector<1x400xf32> to vector<8x400xf32>
    %6 = arith.addf %3, %5 : vector<8x400xf32>
    %cst_5 = arith.constant 0.000000e+00 : f32
    %7 = vector.broadcast %cst_5 : f32 to vector<8x400xf32>
    %8 = arith.maximumf %6, %7 : vector<8x400xf32>
    %9 = arith.truncf %8 : vector<8x400xf32> to vector<8x400xbf16>
    %c0_6 = arith.constant 0 : index
    %c0_7 = arith.constant 0 : index
    %10 = vector.load %arg5[%c0_6, %c0_7] : memref<400x40xbf16, #tpu.memory_space<vmem>>, vector<400x40xbf16>
    %cst_8 = arith.constant dense<0.000000e+00> : vector<8x40xf32>
    %11 = tpu.matmul %9, %10, %cst_8 {dimension_numbers = #tpu.dot_dimension_numbers<[1], [0], [0], [1], [0, 0, 1, 1], [], []>} : vector<8x400xbf16>, vector<400x40xbf16>, vector<8x40xf32> -> vector<8x40xf32>
    %c0_9 = arith.constant 0 : index
    %c0_10 = arith.constant 0 : index
    %12 = vector.load %arg6[%c0_9, %c0_10] : memref<1x40xf32, #tpu.memory_space<vmem>>, vector<1x40xf32>
    %13 = vector.broadcast %12 : vector<1x40xf32> to vector<8x40xf32>
    %14 = arith.addf %11, %13 : vector<8x40xf32>
    %15 = vector.extract_strided_slice %14 {offsets = [0, 0], sizes = [8, 20], strides = [1, 1]} : vector<8x40xf32> to vector<8x20xf32>
    %16 = vector.extract_strided_slice %14 {offsets = [0, 20], sizes = [8, 20], strides = [1, 1]} : vector<8x40xf32> to vector<8x20xf32>
    %c0_11 = arith.constant 0 : index
    %c0_12 = arith.constant 0 : index
    %17 = vector.load %arg2[%c0_11, %c0_12] : memref<8x20xf32, #tpu.memory_space<vmem>>, vector<8x20xf32>
    %cst_13 = arith.constant 5.000000e-01 : f32
    %18 = vector.broadcast %cst_13 : f32 to vector<8x20xf32>
    %19 = arith.mulf %18, %16 : vector<8x20xf32>
    %20 = math.exp %19 : vector<8x20xf32>
    %21 = arith.mulf %17, %20 : vector<8x20xf32>
    %22 = arith.addf %15, %21 : vector<8x20xf32>
    %23 = arith.truncf %22 : vector<8x20xf32> to vector<8x20xbf16>
    %c0_14 = arith.constant 0 : index
    %c0_15 = arith.constant 0 : index
    %24 = vector.load %arg7[%c0_14, %c0_15] : memref<20x400xbf16, #tpu.memory_space<vmem>>, vector<20x400xbf16>
    %cst_16 = arith.constant dense<0.000000e+00> : vector<8x400xf32>
    %25 = tpu.matmul %23, %24, %cst_16 {dimension_numbers = #tpu.dot_dimension_numbers<[1], [0], [0], [1], [0, 0, 1, 1], [], []>} : vector<8x20xbf16>, vector<20x400xbf16>, vector<8x400xf32> -> vector<8x400xf32>
    %c0_17 = arith.constant 0 : index
    %c0_18 = arith.constant 0 : index
    %26 = vector.load %arg8[%c0_17, %c0_18] : memref<1x400xf32, #tpu.memory_space<vmem>>, vector<1x400xf32>
    %27 = vector.broadcast %26 : vector<1x400xf32> to vector<8x400xf32>
    %28 = arith.addf %25, %27 : vector<8x400xf32>
    %cst_19 = arith.constant 0.000000e+00 : f32
    %29 = vector.broadcast %cst_19 : f32 to vector<8x400xf32>
    %30 = arith.maximumf %28, %29 : vector<8x400xf32>
    %31 = arith.truncf %30 : vector<8x400xf32> to vector<8x400xbf16>
    %c0_20 = arith.constant 0 : index
    %c0_21 = arith.constant 0 : index
    %32 = vector.load %arg9[%c0_20, %c0_21] : memref<400x784xbf16, #tpu.memory_space<vmem>>, vector<400x784xbf16>
    %cst_22 = arith.constant dense<0.000000e+00> : vector<8x784xf32>
    %33 = tpu.matmul %31, %32, %cst_22 {dimension_numbers = #tpu.dot_dimension_numbers<[1], [0], [0], [1], [0, 0, 1, 1], [], []>} : vector<8x400xbf16>, vector<400x784xbf16>, vector<8x784xf32> -> vector<8x784xf32>
    %c0_23 = arith.constant 0 : index
    %c0_24 = arith.constant 0 : index
    %34 = vector.load %arg10[%c0_23, %c0_24] : memref<1x784xf32, #tpu.memory_space<vmem>>, vector<1x784xf32>
    %35 = vector.broadcast %34 : vector<1x784xf32> to vector<8x784xf32>
    %36 = arith.addf %33, %35 : vector<8x784xf32>
    %37 = arith.negf %36 : vector<8x784xf32>
    %38 = math.exp %37 : vector<8x784xf32>
    %cst_25 = arith.constant 1.000000e+00 : f32
    %39 = vector.broadcast %cst_25 : f32 to vector<8x784xf32>
    %40 = arith.addf %39, %38 : vector<8x784xf32>
    %41 = arith.divf %39, %40 : vector<8x784xf32>
    %c0_26 = arith.constant 0 : index
    %c0_27 = arith.constant 0 : index
    %42 = vector.load %arg11[%c0_26, %c0_27] : memref<8x784xf32, #tpu.memory_space<vmem>>, vector<8x784xf32>
    tpu.vector_store %arg11[%c0_26, %c0_27], %41 {strides = array<i32>} : memref<8x784xf32, #tpu.memory_space<vmem>>, vector<8x784xf32>,
    %c0_28 = arith.constant 0 : index
    %c0_29 = arith.constant 0 : index
    %43 = vector.load %arg12[%c0_28, %c0_29] : memref<8x20xf32, #tpu.memory_space<vmem>>, vector<8x20xf32>
    tpu.vector_store %arg12[%c0_28, %c0_29], %15 {strides = array<i32>} : memref<8x20xf32, #tpu.memory_space<vmem>>, vector<8x20xf32>,
    %c0_30 = arith.constant 0 : index
    %c0_31 = arith.constant 0 : index
    %44 = vector.load %arg13[%c0_30, %c0_31] : memref<8x20xf32, #tpu.memory_space<vmem>>, vector<8x20xf32>
    tpu.vector_store %arg13[%c0_30, %c0_31], %16 {strides = array<i32>} : memref<8x20xf32, #tpu.memory_space<vmem>>, vector<8x20xf32>,
    return
  }
  func.func @transform_0(%arg0: i32) -> (i32, i32) {
    %c0_i32 = arith.constant 0 : i32
    %c0_i32_0 = arith.constant 0 : i32
    return %arg0, %c0_i32 : i32, i32
  }
  func.func @transform_1(%arg0: i32) -> (i32, i32) {
    %c0_i32 = arith.constant 0 : i32
    %c0_i32_0 = arith.constant 0 : i32
    return %arg0, %c0_i32 : i32, i32
  }
  func.func @transform_2(%arg0: i32) -> (i32, i32) {
    %c0_i32 = arith.constant 0 : i32
    %c0_i32_0 = arith.constant 0 : i32
    %c0_i32_1 = arith.constant 0 : i32
    return %c0_i32, %c0_i32_0 : i32, i32
  }
  func.func @transform_3(%arg0: i32) -> (i32, i32) {
    %c0_i32 = arith.constant 0 : i32
    %c0_i32_0 = arith.constant 0 : i32
    %c0_i32_1 = arith.constant 0 : i32
    return %c0_i32, %c0_i32_0 : i32, i32
  }
  func.func @transform_4(%arg0: i32) -> (i32, i32) {
    %c0_i32 = arith.constant 0 : i32
    %c0_i32_0 = arith.constant 0 : i32
    %c0_i32_1 = arith.constant 0 : i32
    return %c0_i32, %c0_i32_0 : i32, i32
  }
  func.func @transform_5(%arg0: i32) -> (i32, i32) {
    %c0_i32 = arith.constant 0 : i32
    %c0_i32_0 = arith.constant 0 : i32
    %c0_i32_1 = arith.constant 0 : i32
    return %c0_i32, %c0_i32_0 : i32, i32
  }
  func.func @transform_6(%arg0: i32) -> (i32, i32) {
    %c0_i32 = arith.constant 0 : i32
    %c0_i32_0 = arith.constant 0 : i32
    %c0_i32_1 = arith.constant 0 : i32
    return %c0_i32, %c0_i32_0 : i32, i32
  }
  func.func @transform_7(%arg0: i32) -> (i32, i32) {
    %c0_i32 = arith.constant 0 : i32
    %c0_i32_0 = arith.constant 0 : i32
    %c0_i32_1 = arith.constant 0 : i32
    return %c0_i32, %c0_i32_0 : i32, i32
  }
  func.func @transform_8(%arg0: i32) -> (i32, i32) {
    %c0_i32 = arith.constant 0 : i32
    %c0_i32_0 = arith.constant 0 : i32
    %c0_i32_1 = arith.constant 0 : i32
    return %c0_i32, %c0_i32_0 : i32, i32
  }
  func.func @transform_9(%arg0: i32) -> (i32, i32) {
    %c0_i32 = arith.constant 0 : i32
    %c0_i32_0 = arith.constant 0 : i32
    %c0_i32_1 = arith.constant 0 : i32
    return %c0_i32, %c0_i32_0 : i32, i32
  }
  func.func @transform_10(%arg0: i32) -> (i32, i32) {
    %c0_i32 = arith.constant 0 : i32
    %c0_i32_0 = arith.constant 0 : i32
    return %arg0, %c0_i32 : i32, i32
  }
  func.func @transform_11(%arg0: i32) -> (i32, i32) {
    %c0_i32 = arith.constant 0 : i32
    %c0_i32_0 = arith.constant 0 : i32
    return %arg0, %c0_i32 : i32, i32
  }
  func.func @transform_12(%arg0: i32) -> (i32, i32) {
    %c0_i32 = arith.constant 0 : i32
    %c0_i32_0 = arith.constant 0 : i32
    return %arg0, %c0_i32 : i32, i32
  }
}

</mosaic_0001>

<bundles_post_ra>
// kernel: vae_forward.1
= control target key start
LH: loop header
LB: loop body
LE: loop exit
PB: predicated region body
PF: predicated region fallthrough
CT: control target
= control target key end

     0   :  { %18 = vsyncpa [#allocation3], 0  ;;  %v4816_v2 = vmov 0   ;;  %vm1253_vm0 = vcmask 130048   ;;  %s6283_s0 = inlined_call_operand.vmem [shape: f32[8,784], index: 0, kind: input, shape index: {}]   ;;  %s6284_s1 = inlined_call_operand.vmem [shape: f32[8,20], index: 1, kind: input, shape index: {}]   ;;  %s6285_s2 = inlined_call_operand.vmem [shape: bf16[784,400], index: 2, kind: input, shape index: {}]   ;;  %s6286_s3 = inlined_call_operand.vmem [shape: f32[1,400], index: 3, kind: input, shape index: {}]   ;;  %s6287_s4 = inlined_call_operand.vmem [shape: bf16[400,40], index: 4, kind: input, shape index: {}]   ;;  %s6288_s5 = inlined_call_operand.vmem [shape: f32[1,40], index: 5, kind: input, shape index: {}]   ;;  %s6289_s6 = inlined_call_operand.vmem [shape: bf16[20,400], index: 6, kind: input, shape index: {}]   ;;  %s6290_s7 = inlined_call_operand.vmem [shape: f32[1,400], index: 7, kind: input, shape index: {}]   ;;  %s6291_s8 = inlined_call_operand.vmem [shape: bf16[400,784], index: 8, kind: input, shape index: {}]   ;;  %s6292_s9 = inlined_call_operand.vmem [shape: f32[1,784], index: 9, kind: input, shape index: {}]   ;;  %s6293_s10 = inlined_call_operand.hbm [shape: f32[8,784], index: 10, kind: output, shape index: {0}]   ;;  %s6294_s11 = inlined_call_operand.hbm [shape: f32[8,20], index: 11, kind: output, shape index: {1}]   ;;  %s6295_s12 = inlined_call_operand.hbm [shape: f32[8,20], index: 12, kind: output, shape index: {2}]  }
   0x1   :  { %v4137_v0 = vld [vmem:[%s6285_s2 + $0x4] ss:$16 sps:$4 sm:$0xff]   ;;  %1412 = vmatprep.mubr.bf16.mxu1 %v4816_v2  ;;  %v4141_v3 = vld [vmem:[%s6285_s2] ss:$16 sps:$4 sm:$0xff]   ;;  %v4145_v8 = vld [vmem:[%s6285_s2 + $0x8] ss:$16 sps:$4 sm:$0xff]  }
   0x2   :  { %v4139_v1 = vld [vmem:[%s6285_s2 + $0x604] ss:$16 sps:$4 sm:$0xff]   ;;  %1257 = vmatprep.subr.bf16.mxu0 %v4137_v0  ;;  %v4142_v4 = vld [vmem:[%s6285_s2 + $0x600] ss:$16 sps:$4 sm:$0xff]   ;;  %v4147_v9 = vld [vmem:[%s6285_s2 + $0xc] ss:$16 sps:$4 sm:$0xff]  }
   0x3   :  { %1380 = vmatprep.subr.bf16.mxu1 %v4139_v1  ;;  %v4143_v5 = vld [vmem:[%s6285_s2 + $0x24] ss:$16 sps:$4 sm:$0xff]   ;;  %1258 = vmatpush1.bf16.msra.mxu0 %v4141_v3  ;;  %v4148_v10 = vld [vmem:[%s6285_s2 + $0x20] ss:$16 sps:$4 sm:$0xff]   ;;  %v4151_v12 = vld [vmem:[%s6285_s2 + $0x28] ss:$16 sps:$4 sm:$0xff]  }
   0x4   :  { %v47_v6 = vld [vmem:[%s6283_s0 + $0x30] sm:$0xff]  ;;  %1381 = vmatpush1.bf16.msra.mxu1 %v4142_v4  ;;  %1259 = vmatprep.subr.bf16.mxu0 %v4143_v5  ;;  %v4153_v13 = vld [vmem:[%s6285_s2 + $0x2c] ss:$16 sps:$4 sm:$0xff]   ;;  %v4157_v17 = vld [vmem:[%s6285_s2 + $0x48] ss:$16 sps:$4 sm:$0xff]  }
   0x5   :  { %v4905_v7 = vpack.c.bf16 %v47_v6, %v47_v6  ;;  %v4149_v11 = vld [vmem:[%s6285_s2 + $0x44] ss:$16 sps:$4 sm:$0xff]   ;;  %1421 = vmatprep.subr.bf16.mxu1 %v4147_v9  ;;  %v4154_v14 = vld [vmem:[%s6285_s2 + $0x40] ss:$16 sps:$4 sm:$0xff]   ;;  %v4159_v16 = vld [vmem:[%s6285_s2 + $0x4c] ss:$16 sps:$4 sm:$0xff]  }
   0x6   :  { %v4155_v15 = vld [vmem:[%s6285_s2 + $0x64] ss:$16 sps:$4 sm:$0xff]   ;;  %v4160_v18 = vld [vmem:[%s6285_s2 + $0x60] ss:$16 sps:$4 sm:$0xff]   ;;  %v4165_v20 = vld [vmem:[%s6285_s2 + $0x6c] ss:$16 sps:$4 sm:$0xff]  }
   0x7   :  { %3817 = vmatmul.mubr.msk.bf16.vlgmr.msra.gmra.mrb[0].mxu1 %vm1253_vm0, %v4905_v7  ;;  %1260 = vmatpush1.bf16.msra.mxu0 %v4148_v10  ;;  %v4161_v19 = vld [vmem:[%s6285_s2 + $0x84] ss:$16 sps:$4 sm:$0xff]   ;;  %v4163_v21 = vld [vmem:[%s6285_s2 + $0x68] ss:$16 sps:$4 sm:$0xff]   ;;  %v4166_v22 = vld [vmem:[%s6285_s2 + $0x80] ss:$16 sps:$4 sm:$0xff]  }
   0x8   :  { %1422 = vmatpush1.bf16.msra.mxu1 %v4145_v8  ;;  %1261 = vmatprep.subr.bf16.mxu0 %v4149_v11  ;;  %v4167_v23 = vld [vmem:[%s6285_s2 + $0xa4] ss:$16 sps:$4 sm:$0xff]   ;;  %v4171_v24 = vld [vmem:[%s6285_s2 + $0x8c] ss:$16 sps:$4 sm:$0xff]   ;;  %v4169_v25 = vld [vmem:[%s6285_s2 + $0x88] ss:$16 sps:$4 sm:$0xff]  }
   0x9   :  { %1423 = vmatprep.subr.bf16.mxu1 %v4153_v13  ;;  %v4172_v26 = vld [vmem:[%s6285_s2 + $0xa0] ss:$16 sps:$4 sm:$0xff]   ;;  %v4173_v27 = vld [vmem:[%s6285_s2 + $0xc4] ss:$16 sps:$4 sm:$0xff]   ;;  %v4177_v28 = vld [vmem:[%s6285_s2 + $0xac] ss:$16 sps:$4 sm:$0xff]  }
   0xa   :  { %v4175_v29 = vld [vmem:[%s6285_s2 + $0xa8] ss:$16 sps:$4 sm:$0xff]   ;;  %v4178_v30 = vld [vmem:[%s6285_s2 + $0xc0] ss:$16 sps:$4 sm:$0xff]   ;;  %v4179_v31 = vld [vmem:[%s6285_s2 + $0xe4] ss:$16 sps:$4 sm:$0xff]  }
   0xb   :  { %1262 = vmatpush1.bf16.msra.mxu0 %v4154_v14  ;;  %v4183_v32 = vld [vmem:[%s6285_s2 + $0xcc] ss:$16 sps:$4 sm:$0xff]   ;;  %v4181_v33 = vld [vmem:[%s6285_s2 + $0xc8] ss:$16 sps:$4 sm:$0xff]   ;;  %v4184_v34 = vld [vmem:[%s6285_s2 + $0xe0] ss:$16 sps:$4 sm:$0xff]  }
   0xc   :  { %1424 = vmatpush1.bf16.msra.mxu1 %v4151_v12  ;;  %1263 = vmatprep.subr.bf16.mxu0 %v4155_v15  ;;  %v4185_v35 = vld [vmem:[%s6285_s2 + $0x104] ss:$16 sps:$4 sm:$0xff]   ;;  %v4189_v36 = vld [vmem:[%s6285_s2 + $0xec] ss:$16 sps:$4 sm:$0xff]   ;;  %v4187_v37 = vld [vmem:[%s6285_s2 + $0xe8] ss:$16 sps:$4 sm:$0xff]  }
   0xd   :  { %1425 = vmatprep.subr.bf16.mxu1 %v4159_v16  ;;  %v4190_v38 = vld [vmem:[%s6285_s2 + $0x100] ss:$16 sps:$4 sm:$0xff]   ;;  %v4191_v39 = vld [vmem:[%s6285_s2 + $0x124] ss:$16 sps:$4 sm:$0xff]   ;;  %v4195_v40 = vld [vmem:[%s6285_s2 + $0x10c] ss:$16 sps:$4 sm:$0xff]  }
   0xe   :  { %v4193_v41 = vld [vmem:[%s6285_s2 + $0x108] ss:$16 sps:$4 sm:$0xff]   ;;  %v4196_v42 = vld [vmem:[%s6285_s2 + $0x120] ss:$16 sps:$4 sm:$0xff]   ;;  %v4197_v43 = vld [vmem:[%s6285_s2 + $0x144] ss:$16 sps:$4 sm:$0xff]  }
   0xf   :  { %1264 = vmatpush1.bf16.msra.mxu0 %v4160_v18  ;;  %v4201_v44 = vld [vmem:[%s6285_s2 + $0x12c] ss:$16 sps:$4 sm:$0xff]   ;;  %v4199_v45 = vld [vmem:[%s6285_s2 + $0x128] ss:$16 sps:$4 sm:$0xff]   ;;  %v4202_v46 = vld [vmem:[%s6285_s2 + $0x140] ss:$16 sps:$4 sm:$0xff]  }
  0x10   :  { %1426 = vmatpush1.bf16.msra.mxu1 %v4157_v17  ;;  %1265 = vmatprep.subr.bf16.mxu0 %v4161_v19  ;;  %v4203_v47 = vld [vmem:[%s6285_s2 + $0x164] ss:$16 sps:$4 sm:$0xff]   ;;  %v4207_v48 = vld [vmem:[%s6285_s2 + $0x14c] ss:$16 sps:$4 sm:$0xff]   ;;  %v4205_v50 = vld [vmem:[%s6285_s2 + $0x148] ss:$16 sps:$4 sm:$0xff]  }
  0x11   :  { %1427 = vmatprep.subr.bf16.mxu1 %v4165_v20  ;;  %v42_v49 = vld [vmem:[%s6283_s0 + $0x8] sm:$0xff]  ;;  %v4208_v51 = vld [vmem:[%s6285_s2 + $0x160] ss:$16 sps:$4 sm:$0xff]   ;;  %v4209_v53 = vld [vmem:[%s6285_s2 + $0x184] ss:$16 sps:$4 sm:$0xff]  }
  0x12   :  { %v49_v52 = vpack.c.bf16 %v42_v49, %v42_v49  ;;  %v4213_v54 = vld [vmem:[%s6285_s2 + $0x16c] ss:$16 sps:$4 sm:$0xff]   ;;  %v4211_v55 = vld [vmem:[%s6285_s2 + $0x168] ss:$16 sps:$4 sm:$0xff]   ;;  %v4214_v56 = vld [vmem:[%s6285_s2 + $0x180] ss:$16 sps:$4 sm:$0xff]  }
  0x13   :  { %1266 = vmatpush1.bf16.msra.mxu0 %v4166_v22  ;;  %v4215_v57 = vld [vmem:[%s6285_s2 + $0x1a4] ss:$16 sps:$4 sm:$0xff]   ;;  %v4219_v58 = vld [vmem:[%s6285_s2 + $0x18c] ss:$16 sps:$4 sm:$0xff]   ;;  %v4217_v59 = vld [vmem:[%s6285_s2 + $0x188] ss:$16 sps:$4 sm:$0xff]  }
  0x14   :  { %1428 = vmatpush1.bf16.msra.mxu1 %v4163_v21  ;;  %1267 = vmatprep.subr.bf16.mxu0 %v4167_v23  ;;  %v4220_v60 = vld [vmem:[%s6285_s2 + $0x1a0] ss:$16 sps:$4 sm:$0xff]   ;;  %v4221_v61 = vld [vmem:[%s6285_s2 + $0x1c4] ss:$16 sps:$4 sm:$0xff]   ;;  %v4225_v62 = vld [vmem:[%s6285_s2 + $0x1ac] ss:$16 sps:$4 sm:$0xff]  }
  0x15   :  { %1429 = vmatprep.subr.bf16.mxu1 %v4171_v24  ;;  %1289 = vmatprep.mubr.bf16.mxu0 %v49_v52  ;;  %v4223_v63 = vld [vmem:[%s6285_s2 + $0x1a8] ss:$16 sps:$4 sm:$0xff]   ;;  %v4226_v0 = vld [vmem:[%s6285_s2 + $0x1c0] ss:$16 sps:$4 sm:$0xff]   ;;  %v4227_v1 = vld [vmem:[%s6285_s2 + $0x1e4] ss:$16 sps:$4 sm:$0xff]  }
  0x16   :  { %1453 = vmatprep.mubr.bf16.mxu1 %v49_v52  ;;  %v4231_v3 = vld [vmem:[%s6285_s2 + $0x1cc] ss:$16 sps:$4 sm:$0xff]   ;;  %v4229_v4 = vld [vmem:[%s6285_s2 + $0x1c8] ss:$16 sps:$4 sm:$0xff]   ;;  %v4232_v5 = vld [vmem:[%s6285_s2 + $0x1e0] ss:$16 sps:$4 sm:$0xff]  }
  0x17   :  { %1268 = vmatpush1.bf16.msra.mxu0 %v4172_v26  ;;  %v4235_v6 = vld [vmem:[%s6285_s2 + $0x204] ss:$16 sps:$4 sm:$0xff]   ;;  %v4238_v9 = vld [vmem:[%s6285_s2 + $0x1ec] ss:$16 sps:$4 sm:$0xff]   ;;  %v4233_v10 = vld [vmem:[%s6285_s2 + $0x200] ss:$16 sps:$4 sm:$0xff]  }
  0x18   :  { %1430 = vmatpush1.bf16.msra.mxu1 %v4169_v25  ;;  %1269 = vmatprep.subr.bf16.mxu0 %v4173_v27  ;;  %v41_v8 = vld [vmem:[%s6283_s0] sm:$0xff]  ;;  %v4236_v12 = vld [vmem:[%s6285_s2 + $0x1e8] ss:$16 sps:$4 sm:$0xff]   ;;  %v4244_v14 = vld [vmem:[%s6285_s2 + $0x20c] ss:$16 sps:$4 sm:$0xff]  }
  0x19   :  { %1431 = vmatprep.subr.bf16.mxu1 %v4177_v28  ;;  %v48_v11 = vpack.c.bf16 %v41_v8, %v41_v8  ;;  %v4241_v13 = vld [vmem:[%s6285_s2 + $0x224] ss:$16 sps:$4 sm:$0xff]   ;;  %v4239_v15 = vld [vmem:[%s6285_s2 + $0x220] ss:$16 sps:$4 sm:$0xff]   ;;  %v4242_v16 = vld [vmem:[%s6285_s2 + $0x208] ss:$16 sps:$4 sm:$0xff]  }
  0x1a   :  { %v4247_v17 = vld [vmem:[%s6285_s2 + $0x244] ss:$16 sps:$4 sm:$0xff]   ;;  %v4250_v18 = vld [vmem:[%s6285_s2 + $0x22c] ss:$16 sps:$4 sm:$0xff]   ;;  %v4245_v19 = vld [vmem:[%s6285_s2 + $0x240] ss:$16 sps:$4 sm:$0xff]  }
  0x1b   :  { %1270 = vmatpush1.bf16.msra.mxu0 %v4178_v30  ;;  %v4248_v20 = vld [vmem:[%s6285_s2 + $0x228] ss:$16 sps:$4 sm:$0xff]   ;;  %v4253_v21 = vld [vmem:[%s6285_s2 + $0x264] ss:$16 sps:$4 sm:$0xff]   ;;  %v4256_v22 = vld [vmem:[%s6285_s2 + $0x24c] ss:$16 sps:$4 sm:$0xff]  }
  0x1c   :  { %1432 = vmatpush1.bf16.msra.mxu1 %v4175_v29  ;;  %1271 = vmatprep.subr.bf16.mxu0 %v4179_v31  ;;  %v4251_v23 = vld [vmem:[%s6285_s2 + $0x260] ss:$16 sps:$4 sm:$0xff]   ;;  %v4254_v24 = vld [vmem:[%s6285_s2 + $0x248] ss:$16 sps:$4 sm:$0xff]   ;;  %v4259_v25 = vld [vmem:[%s6285_s2 + $0x284] ss:$16 sps:$4 sm:$0xff]  }
  0x1d   :  { %1433 = vmatprep.subr.bf16.mxu1 %v4183_v32  ;;  %v4262_v26 = vld [vmem:[%s6285_s2 + $0x26c] ss:$16 sps:$4 sm:$0xff]   ;;  %v4257_v27 = vld [vmem:[%s6285_s2 + $0x280] ss:$16 sps:$4 sm:$0xff]   ;;  %v4260_v28 = vld [vmem:[%s6285_s2 + $0x268] ss:$16 sps:$4 sm:$0xff]  }
  0x1e   :  { %v4265_v29 = vld [vmem:[%s6285_s2 + $0x2a4] ss:$16 sps:$4 sm:$0xff]   ;;  %v4268_v30 = vld [vmem:[%s6285_s2 + $0x28c] ss:$16 sps:$4 sm:$0xff]   ;;  %v4263_v31 = vld [vmem:[%s6285_s2 + $0x2a0] ss:$16 sps:$4 sm:$0xff]  }
  0x1f   :  { %1272 = vmatpush1.bf16.msra.mxu0 %v4184_v34  ;;  %v4266_v32 = vld [vmem:[%s6285_s2 + $0x288] ss:$16 sps:$4 sm:$0xff]   ;;  %v4274_v34 = vld [vmem:[%s6285_s2 + $0x2ac] ss:$16 sps:$4 sm:$0xff]   ;;  %v4287_v49 = vld [vmem:[%s6285_s2 + $0x320] ss:$16 sps:$4 sm:$0xff]  }
  0x20   :  { %1434 = vmatpush1.bf16.msra.mxu1 %v4181_v33  ;;  %1273 = vmatprep.subr.bf16.mxu0 %v4185_v35  ;;  %v4271_v33 = vld [vmem:[%s6285_s2 + $0x2c4] ss:$16 sps:$4 sm:$0xff]   ;;  %v44_v35 = vld [vmem:[%s6283_s0 + $0x18] sm:$0xff] }
  0x21   :  { %1435 = vmatprep.subr.bf16.mxu1 %v4189_v36  ;;  %v4269_v36 = vld [vmem:[%s6285_s2 + $0x2c0] ss:$16 sps:$4 sm:$0xff]   ;;  %v4298_v52 = vld [vmem:[%s6285_s2 + $0x32c] ss:$16 sps:$4 sm:$0xff]   ;;  %v4320_v8 = vld [vmem:[%s6285_s2 + $0x3a8] ss:$16 sps:$4 sm:$0xff]  }
  0x23   :  { %1274 = vmatpush1.bf16.msra.mxu0 %v4190_v38  ;;  %v4272_v38 = vld [vmem:[%s6285_s2 + $0x2a8] ss:$16 sps:$4 sm:$0xff]  }
  0x24   :  { %1436 = vmatpush1.bf16.msra.mxu1 %v4187_v37  ;;  %1275 = vmatprep.subr.bf16.mxu0 %v4191_v39  ;;  %v51_v37 = vpack.c.bf16 %v44_v35, %v44_v35  ;;  %v4277_v39 = vld [vmem:[%s6285_s2 + $0x2e4] ss:$16 sps:$4 sm:$0xff]   ;;  %v4353_v35 = vld [vmem:[%s6285_s2 + $0x480] ss:$16 sps:$4 sm:$0xff]  }
  0x25   :  { %1437 = vmatprep.subr.bf16.mxu1 %v4195_v40  ;;  %v4280_v40 = vld [vmem:[%s6285_s2 + $0x2cc] ss:$16 sps:$4 sm:$0xff]  }
  0x27   :  { %1276 = vmatpush1.bf16.msra.mxu0 %v4196_v42  ;;  %v4278_v42 = vld [vmem:[%s6285_s2 + $0x2c8] ss:$16 sps:$4 sm:$0xff]  }
  0x28   :  { %1438 = vmatpush1.bf16.msra.mxu1 %v4193_v41  ;;  %1277 = vmatprep.subr.bf16.mxu0 %v4197_v43  ;;  %v4275_v41 = vld [vmem:[%s6285_s2 + $0x2e0] ss:$16 sps:$4 sm:$0xff]   ;;  %v4283_v43 = vld [vmem:[%s6285_s2 + $0x304] ss:$16 sps:$4 sm:$0xff]  }
  0x29   :  { %1439 = vmatprep.subr.bf16.mxu1 %v4201_v44  ;;  %v4286_v44 = vld [vmem:[%s6285_s2 + $0x2ec] ss:$16 sps:$4 sm:$0xff]  }
  0x2b   :  { %1278 = vmatpush1.bf16.msra.mxu0 %v4202_v46  ;;  %v4284_v46 = vld [vmem:[%s6285_s2 + $0x2e8] ss:$16 sps:$4 sm:$0xff]  }
  0x2c   :  { %1440 = vmatpush1.bf16.msra.mxu1 %v4199_v45  ;;  %1279 = vmatprep.subr.bf16.mxu0 %v4203_v47  ;;  %v4281_v45 = vld [vmem:[%s6285_s2 + $0x300] ss:$16 sps:$4 sm:$0xff]   ;;  %v4289_v47 = vld [vmem:[%s6285_s2 + $0x324] ss:$16 sps:$4 sm:$0xff]  }
  0x2d   :  { %1441 = vmatprep.subr.bf16.mxu1 %v4207_v48  ;;  %v4292_v48 = vld [vmem:[%s6285_s2 + $0x30c] ss:$16 sps:$4 sm:$0xff]  }
  0x2f   :  { %1280 = vmatpush1.bf16.msra.mxu0 %v4208_v51  ;;  %v4295_v51 = vld [vmem:[%s6285_s2 + $0x344] ss:$16 sps:$4 sm:$0xff]  }
  0x30   :  { %1442 = vmatpush1.bf16.msra.mxu1 %v4205_v50  ;;  %1281 = vmatprep.subr.bf16.mxu0 %v4209_v53  ;;  %v4290_v50 = vld [vmem:[%s6285_s2 + $0x308] ss:$16 sps:$4 sm:$0xff]   ;;  %v4293_v53 = vld [vmem:[%s6285_s2 + $0x340] ss:$16 sps:$4 sm:$0xff]  }
  0x31   :  { %1443 = vmatprep.subr.bf16.mxu1 %v4213_v54  ;;  %v4296_v54 = vld [vmem:[%s6285_s2 + $0x328] ss:$16 sps:$4 sm:$0xff]  }
  0x33   :  { %1282 = vmatpush1.bf16.msra.mxu0 %v4214_v56  ;;  %v4304_v56 = vld [vmem:[%s6285_s2 + $0x34c] ss:$16 sps:$4 sm:$0xff]  }
  0x34   :  { %1444 = vmatpush1.bf16.msra.mxu1 %v4211_v55  ;;  %1283 = vmatprep.subr.bf16.mxu0 %v4215_v57  ;;  %v4301_v55 = vld [vmem:[%s6285_s2 + $0x364] ss:$16 sps:$4 sm:$0xff]   ;;  %v4299_v57 = vld [vmem:[%s6285_s2 + $0x360] ss:$16 sps:$4 sm:$0xff]  }
  0x35   :  { %1445 = vmatprep.subr.bf16.mxu1 %v4219_v58  ;;  %v4302_v58 = vld [vmem:[%s6285_s2 + $0x348] ss:$16 sps:$4 sm:$0xff]  }
  0x37   :  { %1284 = vmatpush1.bf16.msra.mxu0 %v4220_v60  ;;  %v4310_v60 = vld [vmem:[%s6285_s2 + $0x36c] ss:$16 sps:$4 sm:$0xff]  }
  0x38   :  { %1446 = vmatpush1.bf16.msra.mxu1 %v4217_v59  ;;  %1285 = vmatprep.subr.bf16.mxu0 %v4221_v61  ;;  %v4307_v59 = vld [vmem:[%s6285_s2 + $0x384] ss:$16 sps:$4 sm:$0xff]   ;;  %v4305_v61 = vld [vmem:[%s6285_s2 + $0x380] ss:$16 sps:$4 sm:$0xff]  }
  0x39   :  { %1447 = vmatprep.subr.bf16.mxu1 %v4225_v62  ;;  %v4308_v62 = vld [vmem:[%s6285_s2 + $0x368] ss:$16 sps:$4 sm:$0xff]  }
  0x3b   :  { %1286 = vmatpush1.bf16.msra.mxu0 %v4226_v0  ;;  %v4316_v0 = vld [vmem:[%s6285_s2 + $0x38c] ss:$16 sps:$4 sm:$0xff]  }
  0x3c   :  { %1448 = vmatpush1.bf16.msra.mxu1 %v4223_v63  ;;  %1287 = vmatprep.subr.bf16.mxu0 %v4227_v1  ;;  %v4313_v63 = vld [vmem:[%s6285_s2 + $0x3a4] ss:$16 sps:$4 sm:$0xff]   ;;  %v4311_v1 = vld [vmem:[%s6285_s2 + $0x3a0] ss:$16 sps:$4 sm:$0xff]  }
  0x3d   :  { %1449 = vmatprep.subr.bf16.mxu1 %v4231_v3  ;;  %v4314_v3 = vld [vmem:[%s6285_s2 + $0x388] ss:$16 sps:$4 sm:$0xff]  }
  0x3f   :  { %1288 = vmatpush1.bf16.msra.mxu0 %v4232_v5  ;;  %v4322_v5 = vld [vmem:[%s6285_s2 + $0x3ac] ss:$16 sps:$4 sm:$0xff]  }
  0x40   :  { %1450 = vmatpush1.bf16.msra.mxu1 %v4229_v4  ;;  %1298 = vmatprep.subr.bf16.mxu0 %v4235_v6  ;;  %v4319_v4 = vld [vmem:[%s6285_s2 + $0x3c4] ss:$16 sps:$4 sm:$0xff]   ;;  %v4317_v6 = vld [vmem:[%s6285_s2 + $0x3c0] ss:$16 sps:$4 sm:$0xff]  }
  0x41   :  { %1451 = vmatprep.subr.bf16.mxu1 %v4238_v9  ;;  %v4325_v9 = vld [vmem:[%s6285_s2 + $0x3e4] ss:$16 sps:$4 sm:$0xff]  }
  0x42   :  { %1290 = vmatmul.mubr.bf16.vlgmr.msra.gmra.mrb[0].mxu0 %v48_v11 }
  0x43   :  { %1299 = vmatpush1.bf16.msra.mxu0 %v4233_v10  ;;  %1330 = vmatprep.mubr.bf16.mxu0 %v51_v37  ;;  %v4328_v10 = vld [vmem:[%s6285_s2 + $0x3cc] ss:$16 sps:$4 sm:$0xff]  }
  0x44   :  { %1452 = vmatpush1.bf16.msra.mxu1 %v4236_v12  ;;  %1300 = vmatprep.subr.bf16.mxu0 %v4241_v13  ;;  %v4326_v12 = vld [vmem:[%s6285_s2 + $0x3c8] ss:$16 sps:$4 sm:$0xff]   ;;  %v43_v13 = vld [vmem:[%s6283_s0 + $0x10] sm:$0xff] }
  0x45   :  { %1462 = vmatprep.subr.bf16.mxu1 %v4244_v14  ;;  %v4331_v14 = vld [vmem:[%s6285_s2 + $0x404] ss:$16 sps:$4 sm:$0xff]  }
  0x47   :  { %1454 = vmatmul.mubr.bf16.vlgmr.msra.gmra.mrb[4].mxu1 %v48_v11  ;;  %1301 = vmatpush1.bf16.msra.mxu0 %v4239_v15  ;;  %v4323_v11 = vld [vmem:[%s6285_s2 + $0x3e0] ss:$16 sps:$4 sm:$0xff]   ;;  %v4334_v15 = vld [vmem:[%s6285_s2 + $0x3ec] ss:$16 sps:$4 sm:$0xff]  }
  0x48   :  { %1463 = vmatpush1.bf16.msra.mxu1 %v4242_v16  ;;  %1302 = vmatprep.subr.bf16.mxu0 %v4247_v17  ;;  %v4329_v16 = vld [vmem:[%s6285_s2 + $0x400] ss:$16 sps:$4 sm:$0xff]   ;;  %v50_v17 = vpack.c.bf16 %v43_v13, %v43_v13 }
  0x49   :  { %1464 = vmatprep.subr.bf16.mxu1 %v4250_v18  ;;  %1494 = vmatprep.mubr.bf16.mxu1 %v51_v37  ;;  %v4332_v18 = vld [vmem:[%s6285_s2 + $0x3e8] ss:$16 sps:$4 sm:$0xff]   ;;  %v4361_v37 = vld [vmem:[%s6285_s2 + $0x4a4] ss:$16 sps:$4 sm:$0xff]   ;;  %v4413_v13 = vld [vmem:[%s6285_s2 + $0x5c0] ss:$16 sps:$4 sm:$0xff]  }
  0x4b   :  { %1303 = vmatpush1.bf16.msra.mxu0 %v4245_v19  ;;  %v4337_v19 = vld [vmem:[%s6285_s2 + $0x424] ss:$16 sps:$4 sm:$0xff]  }
  0x4c   :  { %1465 = vmatpush1.bf16.msra.mxu1 %v4248_v20  ;;  %1304 = vmatprep.subr.bf16.mxu0 %v4253_v21  ;;  %v4340_v20 = vld [vmem:[%s6285_s2 + $0x40c] ss:$16 sps:$4 sm:$0xff]  }
  0x4d   :  { %1466 = vmatprep.subr.bf16.mxu1 %v4256_v22  ;;  %v46_v21 = vld [vmem:[%s6283_s0 + $0x28] sm:$0xff] }
  0x4e   :  { %v53_v22 = vpack.c.bf16 %v46_v21, %v46_v21  ;;  %v4431_v21 = vld [vmem:[%s6287_s4 + $0x40] sm:$0xff]  }
  0x4f   :  { %1305 = vmatpush1.bf16.msra.mxu0 %v4251_v23  ;;  %v4335_v23 = vld [vmem:[%s6285_s2 + $0x420] ss:$16 sps:$4 sm:$0xff]  }
  0x50   :  { %1467 = vmatpush1.bf16.msra.mxu1 %v4254_v24  ;;  %1306 = vmatprep.subr.bf16.mxu0 %v4259_v25  ;;  %v4338_v24 = vld [vmem:[%s6285_s2 + $0x408] ss:$16 sps:$4 sm:$0xff]   ;;  %v4343_v25 = vld [vmem:[%s6285_s2 + $0x444] ss:$16 sps:$4 sm:$0xff]  }
  0x51   :  { %1468 = vmatprep.subr.bf16.mxu1 %v4262_v26  ;;  %v4346_v26 = vld [vmem:[%s6285_s2 + $0x42c] ss:$16 sps:$4 sm:$0xff]  }
  0x53   :  { %1307 = vmatpush1.bf16.msra.mxu0 %v4257_v27  ;;  %v4341_v27 = vld [vmem:[%s6285_s2 + $0x440] ss:$16 sps:$4 sm:$0xff]  }
  0x54   :  { %1469 = vmatpush1.bf16.msra.mxu1 %v4260_v28  ;;  %1308 = vmatprep.subr.bf16.mxu0 %v4265_v29  ;;  %v4344_v28 = vld [vmem:[%s6285_s2 + $0x428] ss:$16 sps:$4 sm:$0xff]   ;;  %v4349_v29 = vld [vmem:[%s6285_s2 + $0x464] ss:$16 sps:$4 sm:$0xff]  }
  0x55   :  { %1470 = vmatprep.subr.bf16.mxu1 %v4268_v30  ;;  %v4352_v30 = vld [vmem:[%s6285_s2 + $0x44c] ss:$16 sps:$4 sm:$0xff]  }
  0x57   :  { %1309 = vmatpush1.bf16.msra.mxu0 %v4263_v31  ;;  %v4347_v31 = vld [vmem:[%s6285_s2 + $0x460] ss:$16 sps:$4 sm:$0xff]  }
  0x58   :  { %1471 = vmatpush1.bf16.msra.mxu1 %v4266_v32  ;;  %1310 = vmatprep.subr.bf16.mxu0 %v4271_v33  ;;  %v4350_v32 = vld [vmem:[%s6285_s2 + $0x448] ss:$16 sps:$4 sm:$0xff]   ;;  %v4355_v33 = vld [vmem:[%s6285_s2 + $0x484] ss:$16 sps:$4 sm:$0xff]  }
  0x59   :  { %1472 = vmatprep.subr.bf16.mxu1 %v4274_v34  ;;  %v4358_v34 = vld [vmem:[%s6285_s2 + $0x46c] ss:$16 sps:$4 sm:$0xff]  }
  0x5b   :  { %1311 = vmatpush1.bf16.msra.mxu0 %v4269_v36  ;;  %v4356_v36 = vld [vmem:[%s6285_s2 + $0x468] ss:$16 sps:$4 sm:$0xff]  }
  0x5c   :  { %1473 = vmatpush1.bf16.msra.mxu1 %v4272_v38  ;;  %1312 = vmatprep.subr.bf16.mxu0 %v4277_v39  ;;  %v4364_v38 = vld [vmem:[%s6285_s2 + $0x48c] ss:$16 sps:$4 sm:$0xff]   ;;  %v4359_v39 = vld [vmem:[%s6285_s2 + $0x4a0] ss:$16 sps:$4 sm:$0xff]  }
  0x5d   :  { %1474 = vmatprep.subr.bf16.mxu1 %v4280_v40  ;;  %v4362_v40 = vld [vmem:[%s6285_s2 + $0x488] ss:$16 sps:$4 sm:$0xff]  }
  0x5f   :  { %1313 = vmatpush1.bf16.msra.mxu0 %v4275_v41  ;;  %v4367_v41 = vld [vmem:[%s6285_s2 + $0x4c4] ss:$16 sps:$4 sm:$0xff]  }
  0x60   :  { %1475 = vmatpush1.bf16.msra.mxu1 %v4278_v42  ;;  %1314 = vmatprep.subr.bf16.mxu0 %v4283_v43  ;;  %v4370_v42 = vld [vmem:[%s6285_s2 + $0x4ac] ss:$16 sps:$4 sm:$0xff]   ;;  %v4365_v43 = vld [vmem:[%s6285_s2 + $0x4c0] ss:$16 sps:$4 sm:$0xff]  }
  0x61   :  { %1476 = vmatprep.subr.bf16.mxu1 %v4286_v44  ;;  %v4368_v44 = vld [vmem:[%s6285_s2 + $0x4a8] ss:$16 sps:$4 sm:$0xff]  }
  0x63   :  { %1315 = vmatpush1.bf16.msra.mxu0 %v4281_v45  ;;  %v4373_v45 = vld [vmem:[%s6285_s2 + $0x4e4] ss:$16 sps:$4 sm:$0xff]  }
  0x64   :  { %1477 = vmatpush1.bf16.msra.mxu1 %v4284_v46  ;;  %1316 = vmatprep.subr.bf16.mxu0 %v4289_v47  ;;  %v4376_v46 = vld [vmem:[%s6285_s2 + $0x4cc] ss:$16 sps:$4 sm:$0xff]   ;;  %v4371_v47 = vld [vmem:[%s6285_s2 + $0x4e0] ss:$16 sps:$4 sm:$0xff]  }
  0x65   :  { %1478 = vmatprep.subr.bf16.mxu1 %v4292_v48  ;;  %v4374_v48 = vld [vmem:[%s6285_s2 + $0x4c8] ss:$16 sps:$4 sm:$0xff]  }
  0x67   :  { %1317 = vmatpush1.bf16.msra.mxu0 %v4287_v49  ;;  %v4379_v49 = vld [vmem:[%s6285_s2 + $0x504] ss:$16 sps:$4 sm:$0xff]  }
  0x68   :  { %1479 = vmatpush1.bf16.msra.mxu1 %v4290_v50  ;;  %1318 = vmatprep.subr.bf16.mxu0 %v4295_v51  ;;  %v4382_v50 = vld [vmem:[%s6285_s2 + $0x4ec] ss:$16 sps:$4 sm:$0xff]   ;;  %v4377_v51 = vld [vmem:[%s6285_s2 + $0x500] ss:$16 sps:$4 sm:$0xff]  }
  0x69   :  { %1480 = vmatprep.subr.bf16.mxu1 %v4298_v52  ;;  %v4380_v52 = vld [vmem:[%s6285_s2 + $0x4e8] ss:$16 sps:$4 sm:$0xff]  }
  0x6b   :  { %1319 = vmatpush1.bf16.msra.mxu0 %v4293_v53  ;;  %v4385_v53 = vld [vmem:[%s6285_s2 + $0x524] ss:$16 sps:$4 sm:$0xff]  }
  0x6c   :  { %1481 = vmatpush1.bf16.msra.mxu1 %v4296_v54  ;;  %1320 = vmatprep.subr.bf16.mxu0 %v4301_v55  ;;  %v4388_v54 = vld [vmem:[%s6285_s2 + $0x50c] ss:$16 sps:$4 sm:$0xff]   ;;  %v4383_v55 = vld [vmem:[%s6285_s2 + $0x520] ss:$16 sps:$4 sm:$0xff]  }
  0x6d   :  { %1482 = vmatprep.subr.bf16.mxu1 %v4304_v56  ;;  %v4386_v56 = vld [vmem:[%s6285_s2 + $0x508] ss:$16 sps:$4 sm:$0xff]  }
  0x6f   :  { %1321 = vmatpush1.bf16.msra.mxu0 %v4299_v57  ;;  %v4391_v57 = vld [vmem:[%s6285_s2 + $0x544] ss:$16 sps:$4 sm:$0xff]  }
  0x70   :  { %1483 = vmatpush1.bf16.msra.mxu1 %v4302_v58  ;;  %1322 = vmatprep.subr.bf16.mxu0 %v4307_v59  ;;  %v4394_v58 = vld [vmem:[%s6285_s2 + $0x52c] ss:$16 sps:$4 sm:$0xff]   ;;  %v4389_v59 = vld [vmem:[%s6285_s2 + $0x540] ss:$16 sps:$4 sm:$0xff]  }
  0x71   :  { %1484 = vmatprep.subr.bf16.mxu1 %v4310_v60  ;;  %v4392_v60 = vld [vmem:[%s6285_s2 + $0x528] ss:$16 sps:$4 sm:$0xff]  }
  0x73   :  { %1323 = vmatpush1.bf16.msra.mxu0 %v4305_v61  ;;  %v4397_v61 = vld [vmem:[%s6285_s2 + $0x564] ss:$16 sps:$4 sm:$0xff]  }
  0x74   :  { %1485 = vmatpush1.bf16.msra.mxu1 %v4308_v62  ;;  %1324 = vmatprep.subr.bf16.mxu0 %v4313_v63  ;;  %v4400_v62 = vld [vmem:[%s6285_s2 + $0x54c] ss:$16 sps:$4 sm:$0xff]   ;;  %v4395_v63 = vld [vmem:[%s6285_s2 + $0x560] ss:$16 sps:$4 sm:$0xff]  }
  0x75   :  { %1486 = vmatprep.subr.bf16.mxu1 %v4316_v0  ;;  %v4398_v0 = vld [vmem:[%s6285_s2 + $0x548] ss:$16 sps:$4 sm:$0xff]  }
  0x77   :  { %1325 = vmatpush1.bf16.msra.mxu0 %v4311_v1  ;;  %v4403_v1 = vld [vmem:[%s6285_s2 + $0x584] ss:$16 sps:$4 sm:$0xff]  }
  0x78   :  { %1487 = vmatpush1.bf16.msra.mxu1 %v4314_v3  ;;  %1326 = vmatprep.subr.bf16.mxu0 %v4319_v4  ;;  %v4406_v3 = vld [vmem:[%s6285_s2 + $0x56c] ss:$16 sps:$4 sm:$0xff]   ;;  %v4401_v4 = vld [vmem:[%s6285_s2 + $0x580] ss:$16 sps:$4 sm:$0xff]  }
  0x79   :  { %1488 = vmatprep.subr.bf16.mxu1 %v4322_v5  ;;  %v4404_v5 = vld [vmem:[%s6285_s2 + $0x568] ss:$16 sps:$4 sm:$0xff]  }
  0x7b   :  { %1327 = vmatpush1.bf16.msra.mxu0 %v4317_v6  ;;  %v4409_v6 = vld [vmem:[%s6285_s2 + $0x5a4] ss:$16 sps:$4 sm:$0xff]  }
  0x7c   :  { %1489 = vmatpush1.bf16.msra.mxu1 %v4320_v8  ;;  %1328 = vmatprep.subr.bf16.mxu0 %v4325_v9  ;;  %v4412_v8 = vld [vmem:[%s6285_s2 + $0x58c] ss:$16 sps:$4 sm:$0xff]   ;;  %v4407_v9 = vld [vmem:[%s6285_s2 + $0x5a0] ss:$16 sps:$4 sm:$0xff]  }
  0x7d   :  { %1490 = vmatprep.subr.bf16.mxu1 %v4328_v10  ;;  %v4410_v10 = vld [vmem:[%s6285_s2 + $0x588] ss:$16 sps:$4 sm:$0xff]  }
  0x7f   :  { %1329 = vmatpush1.bf16.msra.mxu0 %v4323_v11  ;;  %v4415_v11 = vld [vmem:[%s6285_s2 + $0x5c4] ss:$16 sps:$4 sm:$0xff]  }
  0x80   :  { %1491 = vmatpush1.bf16.msra.mxu1 %v4326_v12  ;;  %1339 = vmatprep.subr.bf16.mxu0 %v4331_v14  ;;  %v4418_v12 = vld [vmem:[%s6285_s2 + $0x5ac] ss:$16 sps:$4 sm:$0xff]   ;;  %v4416_v14 = vld [vmem:[%s6285_s2 + $0x5a8] ss:$16 sps:$4 sm:$0xff]  }
  0x81   :  { %1492 = vmatprep.subr.bf16.mxu1 %v4334_v15  ;;  %v4421_v15 = vld [vmem:[%s6285_s2 + $0x5e4] ss:$16 sps:$4 sm:$0xff]  }
  0x82   :  { %1331 = vmatmul.mubr.bf16.vlgmr.msra.gmra.mrb[0].mxu0 %v50_v17 }
  0x83   :  { %1340 = vmatpush1.bf16.msra.mxu0 %v4329_v16  ;;  %1371 = vmatprep.mubr.bf16.mxu0 %v53_v22  ;;  %v4424_v16 = vld [vmem:[%s6285_s2 + $0x5cc] ss:$16 sps:$4 sm:$0xff]  }
  0x84   :  { %1493 = vmatpush1.bf16.msra.mxu1 %v4332_v18  ;;  %1341 = vmatprep.subr.bf16.mxu0 %v4337_v19  ;;  %v4422_v18 = vld [vmem:[%s6285_s2 + $0x5c8] ss:$16 sps:$4 sm:$0xff]   ;;  %v45_v19 = vld [vmem:[%s6283_s0 + $0x20] sm:$0xff] }
  0x85   :  { %1503 = vmatprep.subr.bf16.mxu1 %v4340_v20  ;;  %v4427_v20 = vld [vmem:[%s6285_s2 + $0x5ec] ss:$16 sps:$4 sm:$0xff]  }
  0x87   :  { %1495 = vmatmul.mubr.bf16.vlgmr.msra.gmra.mrb[4].mxu1 %v50_v17  ;;  %1342 = vmatpush1.bf16.msra.mxu0 %v4335_v23  ;;  %v4419_v17 = vld [vmem:[%s6285_s2 + $0x5e0] ss:$16 sps:$4 sm:$0xff]  }
  0x88   :  { %1504 = vmatpush1.bf16.msra.mxu1 %v4338_v24  ;;  %1343 = vmatprep.subr.bf16.mxu0 %v4343_v25  ;;  %v4432_v23 = vld [vmem:[%s6287_s4] sm:$0xff]   ;;  %v52_v24 = vpack.c.bf16 %v45_v19, %v45_v19  ;;  %v4430_v25 = vld [vmem:[%s6285_s2 + $0x60c] ss:$16 sps:$4 sm:$0xff]  }
  0x89   :  { %1505 = vmatprep.subr.bf16.mxu1 %v4346_v26  ;;  %1535 = vmatprep.mubr.bf16.mxu1 %v53_v22  ;;  %v4425_v22 = vld [vmem:[%s6285_s2 + $0x5e8] ss:$16 sps:$4 sm:$0xff]  }
  0x8a   :  { %v4433_v26 = vld [vmem:[%s6287_s4 + $0x48] sm:$0xff]  }
  0x8b   :  { %1344 = vmatpush1.bf16.msra.mxu0 %v4341_v27  ;;  %v4428_v27 = vld [vmem:[%s6285_s2 + $0x608] ss:$16 sps:$4 sm:$0xff]  }
  0x8c   :  { %1506 = vmatpush1.bf16.msra.mxu1 %v4344_v28  ;;  %1345 = vmatprep.subr.bf16.mxu0 %v4349_v29  ;;  %v4434_v28 = vld [vmem:[%s6287_s4 + $0x8] sm:$0xff]   ;;  %v4435_v29 = vld [vmem:[%s6287_s4 + $0x50] sm:$0xff]  }
  0x8d   :  { %1507 = vmatprep.subr.bf16.mxu1 %v4352_v30  ;;  %v4436_v30 = vld [vmem:[%s6287_s4 + $0x10] sm:$0xff]  }
  0x8f   :  { %1346 = vmatpush1.bf16.msra.mxu0 %v4347_v31  ;;  %v4438_v31 = vld [vmem:[%s6287_s4 + $0x58] sm:$0xff]  }
  0x90   :  { %1508 = vmatpush1.bf16.msra.mxu1 %v4350_v32  ;;  %1347 = vmatprep.subr.bf16.mxu0 %v4355_v33  ;;  %v4439_v32 = vld [vmem:[%s6287_s4 + $0x18] sm:$0xff]   ;;  %v4441_v33 = vld [vmem:[%s6287_s4 + $0x60] sm:$0xff]  }
  0x91   :  { %1509 = vmatprep.subr.bf16.mxu1 %v4358_v34  ;;  %v4437_v34 = vld [vmem:[%s6287_s4 + $0x80] sm:$0xff]  }
  0x93   :  { %1348 = vmatpush1.bf16.msra.mxu0 %v4353_v35  ;;  %v4442_v35 = vld [vmem:[%s6287_s4 + $0x20] sm:$0xff]  }
  0x94   :  { %1510 = vmatpush1.bf16.msra.mxu1 %v4356_v36  ;;  %1349 = vmatprep.subr.bf16.mxu0 %v4361_v37  ;;  %v4444_v36 = vld [vmem:[%s6287_s4 + $0x68] sm:$0xff]  }
  0x95   :  { %1511 = vmatprep.subr.bf16.mxu1 %v4364_v38  ;;  %v4440_v37 = vld [vmem:[%s6287_s4 + $0x88] sm:$0xff]   ;;  %v4443_v38 = vld [vmem:[%s6287_s4 + $0x90] sm:$0xff]  }
  0x97   :  { %1350 = vmatpush1.bf16.msra.mxu0 %v4359_v39 }
  0x98   :  { %1512 = vmatpush1.bf16.msra.mxu1 %v4362_v40  ;;  %1351 = vmatprep.subr.bf16.mxu0 %v4367_v41 }
  0x99   :  { %1513 = vmatprep.subr.bf16.mxu1 %v4370_v42 }
  0x9b   :  { %1352 = vmatpush1.bf16.msra.mxu0 %v4365_v43 }
  0x9c   :  { %1514 = vmatpush1.bf16.msra.mxu1 %v4368_v44  ;;  %1353 = vmatprep.subr.bf16.mxu0 %v4373_v45 }
  0x9d   :  { %1515 = vmatprep.subr.bf16.mxu1 %v4376_v46 }
  0x9f   :  { %1354 = vmatpush1.bf16.msra.mxu0 %v4371_v47 }
  0xa0   :  { %1516 = vmatpush1.bf16.msra.mxu1 %v4374_v48  ;;  %1355 = vmatprep.subr.bf16.mxu0 %v4379_v49 }
  0xa1   :  { %1517 = vmatprep.subr.bf16.mxu1 %v4382_v50 }
  0xa3   :  { %1356 = vmatpush1.bf16.msra.mxu0 %v4377_v51 }
  0xa4   :  { %1518 = vmatpush1.bf16.msra.mxu1 %v4380_v52  ;;  %1357 = vmatprep.subr.bf16.mxu0 %v4385_v53 }
  0xa5   :  { %1519 = vmatprep.subr.bf16.mxu1 %v4388_v54 }
  0xa7   :  { %1358 = vmatpush1.bf16.msra.mxu0 %v4383_v55 }
  0xa8   :  { %1520 = vmatpush1.bf16.msra.mxu1 %v4386_v56  ;;  %1359 = vmatprep.subr.bf16.mxu0 %v4391_v57 }
  0xa9   :  { %1521 = vmatprep.subr.bf16.mxu1 %v4394_v58 }
  0xab   :  { %1360 = vmatpush1.bf16.msra.mxu0 %v4389_v59 }
  0xac   :  { %1522 = vmatpush1.bf16.msra.mxu1 %v4392_v60  ;;  %1361 = vmatprep.subr.bf16.mxu0 %v4397_v61 }
  0xad   :  { %1523 = vmatprep.subr.bf16.mxu1 %v4400_v62 }
  0xaf   :  { %1362 = vmatpush1.bf16.msra.mxu0 %v4395_v63 }
  0xb0   :  { %1524 = vmatpush1.bf16.msra.mxu1 %v4398_v0  ;;  %1363 = vmatprep.subr.bf16.mxu0 %v4403_v1 }
  0xb1   :  { %1525 = vmatprep.subr.bf16.mxu1 %v4406_v3 }
  0xb3   :  { %1364 = vmatpush1.bf16.msra.mxu0 %v4401_v4 }
  0xb4   :  { %1526 = vmatpush1.bf16.msra.mxu1 %v4404_v5  ;;  %1365 = vmatprep.subr.bf16.mxu0 %v4409_v6 }
  0xb5   :  { %1527 = vmatprep.subr.bf16.mxu1 %v4412_v8 }
  0xb7   :  { %1366 = vmatpush1.bf16.msra.mxu0 %v4407_v9 }
  0xb8   :  { %1528 = vmatpush1.bf16.msra.mxu1 %v4410_v10  ;;  %1367 = vmatprep.subr.bf16.mxu0 %v4415_v11 }
  0xb9   :  { %1529 = vmatprep.subr.bf16.mxu1 %v4418_v12 }
  0xbb   :  { %1368 = vmatpush1.bf16.msra.mxu0 %v4413_v13 }
  0xbc   :  { %1530 = vmatpush1.bf16.msra.mxu1 %v4416_v14  ;;  %1369 = vmatprep.subr.bf16.mxu0 %v4421_v15 }
  0xbd   :  { %1531 = vmatprep.subr.bf16.mxu1 %v4424_v16 }
  0xbf   :  { %1370 = vmatpush1.bf16.msra.mxu0 %v4419_v17 }
  0xc0   :  { %1532 = vmatpush1.bf16.msra.mxu1 %v4422_v18  ;;  %4044 = vmatprep.subr.bf16.mxu0 %v4431_v21 }
  0xc1   :  { %1533 = vmatprep.subr.bf16.mxu1 %v4427_v20 }
  0xc2   :  { %1372 = vmatmul.mubr.bf16.vlgmr.msra.gmra.mrb[0].mxu0 %v52_v24 }
  0xc3   :  { %4045 = vmatpush3.bf16.msra.mxu0 %v4432_v23 }
  0xc4   :  { %1534 = vmatpush1.bf16.msra.mxu1 %v4425_v22  ;;  %4046 = vmatprep.subr.bf16.mxu0 %v4433_v26 }
  0xc5   :  { %1544 = vmatprep.subr.bf16.mxu1 %v4430_v25 }
  0xc7   :  { %1536 = vmatmul.mubr.bf16.vlgmr.msra.gmra.mrb[4].mxu1 %v52_v24  ;;  %4047 = vmatpush3.bf16.msra.mxu0 %v4434_v28 }
  0xc8   :  { %1545 = vmatpush1.bf16.msra.mxu1 %v4428_v27  ;;  %1576 = vmatprep.mubr.bf16.mxu1 %v4816_v2 }
  0xc9   :  { %1843 = vmatprep.subr.bf16.mxu1 %v4816_v2  ;;  %4048 = vmatprep.subr.bf16.mxu0 %v4435_v29 }
  0xcb   :  { %4049 = vmatpush3.bf16.msra.mxu0 %v4436_v30 }
  0xcc   :  { %4050 = vmatprep.subr.bf16.mxu0 %v4438_v31 }
  0xcf   :  { %4051 = vmatpush3.bf16.msra.mxu0 %v4439_v32 }
  0xd0   :  { %4052 = vmatprep.subr.bf16.mxu0 %v4441_v33 }
  0xd3   :  { %3818 = vmatmul.mubr.msk.bf16.vlgmr.msra.gmra.mrb[4].mxu1 %vm1253_vm0, %v4905_v7  ;;  %4053 = vmatpush3.bf16.msra.mxu0 %v4442_v35 }
  0xd4   :  { %1844 = vmatpush1.bf16.msra.mxu1 %v4437_v34  ;;  %4054 = vmatprep.subr.bf16.mxu0 %v4444_v36 }
  0xd5   :  { %1845 = vmatprep.subr.bf16.mxu1 %v4816_v2 }
  0xd8   :  { %1846 = vmatpush1.bf16.msra.mxu1 %v4440_v37 }
  0xd9   :  { %1847 = vmatprep.subr.bf16.mxu1 %v4816_v2 }
  0xda   :  { %v1414_v39 = vpop.f32.mrb[0].mxu1 }
  0xdb   :  { %v1416_v40 = vpop.f32.mrb[1].mxu1 }
  0xdc   :  { %v1418_v41 = vpop.f32.mrb[2].mxu1  ;;  %1848 = vmatpush1.bf16.msra.mxu1 %v4443_v38 }
  0xdd   :  { %v1419_v42 = vpop.f32.mrb[3].mxu1  ;;  %1849 = vmatprep.subr.bf16.mxu1 %v4816_v2 }
  0xde   :  { %19 = vsyncpa [#allocation5], 0  ;;  %v4445_v7 = vld [vmem:[%s6287_s4 + $0x28] sm:$0xff]   ;;  %v4446_v43 = vld [vmem:[%s6287_s4 + $0x98] sm:$0xff]   ;;  %v253_v53 = vlaneseq  ;;  %vm1952_vm1 = vcmask 162816   ;;  %vm1956_vm2 = vcmask 1041408  }
  0xdf   :  { %4055 = vmatpush3.bf16.msra.mxu0 %v4445_v7  ;;  %v4447_v44 = vld [vmem:[%s6287_s4 + $0x70] sm:$0xff]   ;;  %v4449_v46 = vld [vmem:[%s6287_s4 + $0xa0] sm:$0xff]   ;;  %v4450_v47 = vld [vmem:[%s6287_s4 + $0x78] sm:$0xff]   ;;  %s4817_s30 = smov 108  }
  0xe0   :  { %1850 = vmatpush1.bf16.msra.mxu1 %v4446_v43  ;;  %v4448_v45 = vld [vmem:[%s6287_s4 + $0x30] sm:$0xff]   ;;  %4056 = vmatprep.subr.bf16.mxu0 %v4447_v44  ;;  %v4451_v48 = vld [vmem:[%s6287_s4 + $0x38] sm:$0xff]   ;;  %v4452_v49 = vld [vmem:[%s6287_s4 + $0xa8] sm:$0xff]   ;;  %v5587_v54 = vshrl.u32 %v253_v53, 7 }
  0xe1   :  { %1851 = vmatprep.subr.bf16.mxu1 %v4816_v2  ;;  %v4453_v50 = vld [vmem:[%s6287_s4 + $0xb0] sm:$0xff]   ;;  %v4454_v51 = vld [vmem:[%s6287_s4 + $0xb8] sm:$0xff]   ;;  %v4455_v52 = vld [vmem:[%s6287_s4 + $0xc0] sm:$0xff]  }
  0xe2   :  { %v5590_v55 = vsub.s32 0, %v5587_v54  ;;  %v251_v56 = vld [vmem:[%s6286_s3] sm:$0xf]  ;;  %v5596_v57 = vsub.s32 1, %v5587_v54  ;;  %v5601_v10 = vsub.s32 2, %v5587_v54  ;;  %v5604_v11 = vsub.s32 3, %v5587_v54 }
  0xe3   :  { %4057 = vmatpush3.bf16.msra.mxu0 %v4448_v45  ;;  %v4456_v24 = vld [vmem:[%s6289_s6] ss:$16 sps:$4 sm:$0xff]   ;;  %v4458_v25 = vld [vmem:[%s6289_s6 + $0x4] ss:$16 sps:$4 sm:$0xff]   ;;  %v4463_v43 = vld [vmem:[%s6289_s6 + $0xc] ss:$16 sps:$4 sm:$0xff]  }
  0xe4   :  { %1852 = vmatpush1.bf16.msra.mxu1 %v4449_v46  ;;  %4058 = vmatprep.subr.bf16.mxu0 %v4450_v47  ;;  %v256_v58 = vrot.slane %v251_v56, %v5590_v55  ;;  %v260_v59 = vrot.slane %v251_v56, %v5596_v57  ;;  %v264_v12 = vrot.slane %v251_v56, %v5601_v10  ;;  %v3819_v31 = vld [vmem:[%s6288_s5] ss:$0 sm:$0xff]  ;;  %v4474_v47 = vld [vmem:[%s6291_s8 + $0x3c] ss:$28 sps:$4 sm:$0xff]  }
  0xe5   :  { %1853 = vmatprep.subr.bf16.mxu1 %v4816_v2  ;;  %v268_v13 = vrot.slane %v251_v56, %v5604_v11  ;;  %v4466_v45 = vld [vmem:[%s6291_s8] ss:$28 sps:$4 sm:$0xff]  }
  0xe6   :  { %v4468_v46 = vld [vmem:[%s6291_s8 + $0x4] ss:$28 sps:$4 sm:$0xff]  }
  0xe7   :  { %4059 = vmatpush3.bf16.msra.mxu0 %v4451_v48  ;;  %v4472_v48 = vld [vmem:[%s6291_s8 + $0x38] ss:$28 sps:$4 sm:$0xff]   ;;  %v4492_v53 = vld [vmem:[%s6291_s8 + $0xe4] ss:$28 sps:$4 sm:$0xff]  }
  0xe8   :  { %1854 = vmatpush1.bf16.msra.mxu1 %v4452_v49  ;;  %3199 = vmatprep.subr.bf16.mxu0 %v4468_v46  ;;  %v4480_v49 = vld [vmem:[%s6291_s8 + $0x74] ss:$28 sps:$4 sm:$0xff]   ;;  %v4490_v56 = vld [vmem:[%s6291_s8 + $0xe0] ss:$28 sps:$4 sm:$0xff]  }
  0xe9   :  { %1855 = vmatprep.subr.bf16.mxu1 %v4816_v2  ;;  %v4531_v46 = vld [vmem:[%s6291_s8 + $0x23c] ss:$28 sps:$4 sm:$0xff]  }
  0xec   :  { %1856 = vmatpush1.bf16.msra.mxu1 %v4453_v50  ;;  %v4478_v50 = vld [vmem:[%s6291_s8 + $0x70] ss:$28 sps:$4 sm:$0xff]  }
  0xed   :  { %1857 = vmatprep.subr.bf16.mxu1 %v4816_v2 }
  0xf0   :  { %1858 = vmatpush1.bf16.msra.mxu1 %v4454_v51  ;;  %v4486_v51 = vld [vmem:[%s6291_s8 + $0xac] ss:$28 sps:$4 sm:$0xff]  }
  0xf1   :  { %1859 = vmatprep.subr.bf16.mxu1 %v4816_v2 }
  0xf4   :  { %1860 = vmatpush1.bf16.msra.mxu1 %v4455_v52  ;;  %v4484_v52 = vld [vmem:[%s6291_s8 + $0xa8] ss:$28 sps:$4 sm:$0xff]  }
  0xf5   :  { %1969 = vmatprep.subr.bf16.mxu1 %v4458_v25 }
 0x195   :  { %v1373_v60 = vpop.f32.mrb[0].mxu0 }
 0x196   :  { %v4088_v61 = vadd.f32 %v1373_v60, %v256_v58  ;;  %v1375_v62 = vpop.f32.mrb[1].mxu0  ;;  %v4498_v58 = vld [vmem:[%s6291_s8 + $0x11c] ss:$28 sps:$4 sm:$0xff]   ;;  %v4504_v60 = vld [vmem:[%s6291_s8 + $0x154] ss:$28 sps:$4 sm:$0xff]  }
 0x197   :  { %v4090_v63 = vadd.f32 %v1375_v62, %v260_v59  ;;  %v1377_v0 = vpop.f32.mrb[2].mxu0  ;;  %v4496_v59 = vld [vmem:[%s6291_s8 + $0x118] ss:$28 sps:$4 sm:$0xff]   ;;  %v4510_v62 = vld [vmem:[%s6291_s8 + $0x18c] ss:$28 sps:$4 sm:$0xff]  }
 0x198   :  { %v4089_v1 = vadd.f32 %v4088_v61, %v1414_v39  ;;  %v1378_v3 = vpop.f32.mrb[3].mxu0  ;;  %v1898_v39 = vld [vmem:[%s6289_s6 + $0x20] sm:$0x33]  ;;  %v4502_v61 = vld [vmem:[%s6291_s8 + $0x150] ss:$28 sps:$4 sm:$0xff]  }
 0x199   :  { %v4091_v4 = vadd.f32 %v4090_v63, %v1416_v40  ;;  %v3851_v41 = vcombine.high %v1898_v39, %v1898_v39  ;;  %v3850_v42 = vcombine.low %v1898_v39, %v1898_v39  ;;  %v4508_v63 = vld [vmem:[%s6291_s8 + $0x188] ss:$28 sps:$4 sm:$0xff]   ;;  %v4522_v3 = vld [vmem:[%s6291_s8 + $0x1fc] ss:$28 sps:$4 sm:$0xff]  }
 0x19a   :  { %v1585_v5 = vmax.f32 %v4089_v1, 0.0  ;;  %v4516_v0 = vld [vmem:[%s6291_s8 + $0x1c4] ss:$28 sps:$4 sm:$0xff]   ;;  %v4507_v39 = vld [vmem:[%s6291_s8 + $0x15c] ss:$28 sps:$4 sm:$0xff]  }
 0x19b   :  { %v1586_v6 = vmax.f32 %v4091_v4, 0.0  ;;  %v1958_v7 = vsel %vm1956_vm2, %v3850_v42, 0  ;;  %v4514_v1 = vld [vmem:[%s6291_s8 + $0x1c0] ss:$28 sps:$4 sm:$0xff]   ;;  %v4520_v4 = vld [vmem:[%s6291_s8 + $0x1f8] ss:$28 sps:$4 sm:$0xff]  }
 0x19c   :  { %v1589_v9 = vpack.c.bf16 %v1585_v5, %v1585_v5  ;;  %v4528_v5 = vld [vmem:[%s6291_s8 + $0x234] ss:$28 sps:$4 sm:$0xff]  }
 0x19d   :  { %v1590_v8 = vpack.c.bf16 %v1586_v6, %v1586_v6  ;;  %v4526_v6 = vld [vmem:[%s6291_s8 + $0x230] ss:$28 sps:$4 sm:$0xff]  }
 0x19e   :  { %v4511_v42 = vld [vmem:[%s6291_s8 + $0x190] ss:$28 sps:$4 sm:$0xff]  }
 0x19f   :  { %1835 = vmatprep.mubr.bf16.mxu0 %v1590_v8  ;;  %v4534_v8 = vld [vmem:[%s6291_s8 + $0x26c] ss:$28 sps:$4 sm:$0xff]  }
 0x1a0   :  { %1836 = vmatmul.mubr.bf16.vlgmr.msra.gmra.mrb[4].mxu0 %v1589_v9  ;;  %v4532_v9 = vld [vmem:[%s6291_s8 + $0x268] ss:$28 sps:$4 sm:$0xff]  }
 0x1a1   :  { %3200 = vmatpush1.bf16.msra.mxu0 %v4466_v45  ;;  %v4523_v45 = vld [vmem:[%s6291_s8 + $0x200] ss:$28 sps:$4 sm:$0xff]  }
 0x1a2   :  { %3201 = vmatprep.subr.bf16.mxu0 %v4474_v47  ;;  %v4529_v47 = vld [vmem:[%s6291_s8 + $0x238] ss:$28 sps:$4 sm:$0xff]  }
 0x1a5   :  { %3202 = vmatpush1.bf16.msra.mxu0 %v4472_v48  ;;  %v4537_v48 = vld [vmem:[%s6291_s8 + $0x274] ss:$28 sps:$4 sm:$0xff]  }
 0x1a6   :  { %v1578_v14 = vpop.f32.mrb[4].mxu1  ;;  %3203 = vmatprep.subr.bf16.mxu0 %v4480_v49  ;;  %v4535_v49 = vld [vmem:[%s6291_s8 + $0x270] ss:$28 sps:$4 sm:$0xff]  }
 0x1a7   :  { %v4092_v15 = vadd.f32 %v1578_v14, %v264_v12  ;;  %v1580_v16 = vpop.f32.mrb[5].mxu1  ;;  %v4540_v12 = vld [vmem:[%s6291_s8 + $0x2a4] ss:$28 sps:$4 sm:$0xff]   ;;  %v4546_v14 = vld [vmem:[%s6291_s8 + $0x2dc] ss:$28 sps:$4 sm:$0xff]  }
 0x1a8   :  { %v4093_v17 = vadd.f32 %v1580_v16, %v268_v13  ;;  %v1582_v18 = vpop.f32.mrb[6].mxu1  ;;  %v4538_v13 = vld [vmem:[%s6291_s8 + $0x2a0] ss:$28 sps:$4 sm:$0xff]  }
 0x1a9   :  { %v1587_v19 = vmax.f32 %v4092_v15, 0.0  ;;  %v1583_v20 = vpop.f32.mrb[7].mxu1  ;;  %3204 = vmatpush1.bf16.msra.mxu0 %v4478_v50  ;;  %v4544_v15 = vld [vmem:[%s6291_s8 + $0x2d8] ss:$28 sps:$4 sm:$0xff]   ;;  %v1883_v16 = vld [vmem:[%s6284_s1] sm:$0xff] }
 0x1aa   :  { %v1588_v21 = vmax.f32 %v4093_v17, 0.0  ;;  %3205 = vmatprep.subr.bf16.mxu0 %v4486_v51  ;;  %v4543_v50 = vld [vmem:[%s6291_s8 + $0x2ac] ss:$28 sps:$4 sm:$0xff]  }
 0x1ab   :  { %v1591_v23 = vpack.c.bf16 %v1587_v19, %v1587_v19  ;;  %v1899_v19 = vld [vmem:[%s6289_s6 + $0x28] sm:$0x33] }
 0x1ac   :  { %v1592_v22 = vpack.c.bf16 %v1588_v21, %v1588_v21  ;;  %v3852_v25 = vcombine.low %v1899_v19, %v1899_v19  ;;  %v4541_v51 = vld [vmem:[%s6291_s8 + $0x2a8] ss:$28 sps:$4 sm:$0xff]  }
 0x1ad   :  { %3206 = vmatpush1.bf16.msra.mxu0 %v4484_v52  ;;  %v4549_v52 = vld [vmem:[%s6291_s8 + $0x2e4] ss:$28 sps:$4 sm:$0xff]  }
 0x1ae   :  { %3845 = vmatprep.mubr.msk.bf16.mxu1 %vm1253_vm0, %v1592_v22  ;;  %3207 = vmatprep.subr.bf16.mxu0 %v4492_v53  ;;  %v4461_v22 = vld [vmem:[%s6289_s6 + $0x8] ss:$16 sps:$4 sm:$0xff]   ;;  %v4547_v53 = vld [vmem:[%s6291_s8 + $0x2e0] ss:$28 sps:$4 sm:$0xff]  }
 0x1af   :  { %1876 = vmatmul.mubr.bf16.vlgmr.msra.gmra.mrb[8].mxu1 %v1591_v23 }
 0x1b0   :  { %2001 = vmatprep.mubr.bf16.mxu1 %v4816_v2  ;;  %1970 = vmatpush1.bf16.msra.mxu1 %v4456_v24  ;;  %v3853_v24 = vcombine.high %v1899_v19, %v1899_v19  ;;  %v4562_v19 = vld [vmem:[%s6291_s8 + $0x380] ss:$28 sps:$4 sm:$0xff]  }
 0x1b1   :  { %3854 = vmatprep.subr.msk.bf16.mxu1 %vm1956_vm2, %v3851_v41  ;;  %3208 = vmatpush1.bf16.msra.mxu0 %v4490_v56  ;;  %v4513_v41 = vld [vmem:[%s6291_s8 + $0x194] ss:$28 sps:$4 sm:$0xff]  }
 0x1b2   :  { %3209 = vmatprep.subr.bf16.mxu0 %v4498_v58  ;;  %v4552_v56 = vld [vmem:[%s6291_s8 + $0x314] ss:$28 sps:$4 sm:$0xff]   ;;  %v4555_v58 = vld [vmem:[%s6291_s8 + $0x31c] ss:$28 sps:$4 sm:$0xff]  }
 0x1b4   :  { %1972 = vmatpush1.bf16.msra.mxu1 %v1958_v7  ;;  %v4519_v7 = vld [vmem:[%s6291_s8 + $0x1cc] ss:$28 sps:$4 sm:$0xff]  }
 0x1b5   :  { %2010 = vmatprep.subr.bf16.mxu1 %v4463_v43  ;;  %3210 = vmatpush1.bf16.msra.mxu0 %v4496_v59  ;;  %v4517_v43 = vld [vmem:[%s6291_s8 + $0x1c8] ss:$28 sps:$4 sm:$0xff]   ;;  %v4550_v59 = vld [vmem:[%s6291_s8 + $0x310] ss:$28 sps:$4 sm:$0xff]  }
 0x1b6   :  { %3211 = vmatprep.subr.bf16.mxu0 %v4504_v60  ;;  %v4553_v60 = vld [vmem:[%s6291_s8 + $0x318] ss:$28 sps:$4 sm:$0xff]  }
 0x1b9   :  { %3212 = vmatpush1.bf16.msra.mxu0 %v4502_v61  ;;  %v4558_v61 = vld [vmem:[%s6291_s8 + $0x34c] ss:$28 sps:$4 sm:$0xff]  }
 0x1ba   :  { %3213 = vmatprep.subr.bf16.mxu0 %v4510_v62  ;;  %v4561_v62 = vld [vmem:[%s6291_s8 + $0x354] ss:$28 sps:$4 sm:$0xff]  }
 0x1bd   :  { %3214 = vmatpush1.bf16.msra.mxu0 %v4508_v63  ;;  %v4556_v63 = vld [vmem:[%s6291_s8 + $0x348] ss:$28 sps:$4 sm:$0xff]  }
 0x1be   :  { %3215 = vmatprep.subr.bf16.mxu0 %v4516_v0  ;;  %v4559_v0 = vld [vmem:[%s6291_s8 + $0x350] ss:$28 sps:$4 sm:$0xff]  }
 0x1c1   :  { %3216 = vmatpush1.bf16.msra.mxu0 %v4514_v1  ;;  %v4564_v1 = vld [vmem:[%s6291_s8 + $0x384] ss:$28 sps:$4 sm:$0xff]  }
 0x1c2   :  { %3217 = vmatprep.subr.bf16.mxu0 %v4522_v3  ;;  %v4567_v3 = vld [vmem:[%s6291_s8 + $0x38c] ss:$28 sps:$4 sm:$0xff]  }
 0x1c5   :  { %3218 = vmatpush1.bf16.msra.mxu0 %v4520_v4  ;;  %v5850_v4 = vld [vmem:[%s6290_s7] sm:$0xf] }
 0x1c6   :  { %3219 = vmatprep.subr.bf16.mxu0 %v4528_v5  ;;  %v1905_v5 = vrot.slane %v5850_v4, %v5590_v55 }
 0x1c9   :  { %3220 = vmatpush1.bf16.msra.mxu0 %v4526_v6  ;;  %v1909_v6 = vrot.slane %v5850_v4, %v5596_v57 }
 0x1ca   :  { %3221 = vmatprep.subr.bf16.mxu0 %v4534_v8 }
 0x1cd   :  { %3222 = vmatpush1.bf16.msra.mxu0 %v4532_v9 }
 0x1ce   :  { %3223 = vmatprep.subr.bf16.mxu0 %v4540_v12 }
 0x1d1   :  { %3224 = vmatpush1.bf16.msra.mxu0 %v4538_v13 }
 0x1d2   :  { %3225 = vmatprep.subr.bf16.mxu0 %v4546_v14 }
 0x1d5   :  { %3226 = vmatpush1.bf16.msra.mxu0 %v4544_v15 }
 0x1d6   :  { %3227 = vmatprep.subr.bf16.mxu0 %v4552_v56  ;;  %v4606_v56 = vld [vmem:[%s6291_s8 + $0x50c] ss:$28 sps:$4 sm:$0xff]  }
 0x1d9   :  { %3228 = vmatpush1.bf16.msra.mxu0 %v4550_v59  ;;  %v4604_v59 = vld [vmem:[%s6291_s8 + $0x508] ss:$28 sps:$4 sm:$0xff]  }
 0x1da   :  { %3229 = vmatprep.subr.bf16.mxu0 %v4558_v61 }
 0x1dd   :  { %3230 = vmatpush1.bf16.msra.mxu0 %v4556_v63  ;;  %v4615_v63 = vld [vmem:[%s6291_s8 + $0x54c] ss:$28 sps:$4 sm:$0xff]  }
 0x1de   :  { %3240 = vmatprep.subr.bf16.mxu0 %v4564_v1  ;;  %v4613_v1 = vld [vmem:[%s6291_s8 + $0x548] ss:$28 sps:$4 sm:$0xff]  }
 0x273   :  { %v4060_v26 = vpop.f32.mrb[4].mxu0 }
 0x274   :  { %v4061_v27 = vpop.f32.mrb[5].mxu0 }
 0x275   :  { %v4062_v28 = vadd.f32 %v4061_v27, %v4060_v26  ;;  %v4063_v29 = vpop.f32.mrb[6].mxu0  ;;  %v1964_v26 = vsel %vm1956_vm2, %v3852_v25, 0  ;;  %v4471_v27 = vld [vmem:[%s6291_s8 + $0xc] ss:$28 sps:$4 sm:$0xff]  }
 0x276   :  { %v4064_v30 = vpop.f32.mrb[7].mxu0  ;;  %v4477_v29 = vld [vmem:[%s6291_s8 + $0x44] ss:$28 sps:$4 sm:$0xff]  }
 0x277   :  { %v1838_v32 = vadd.f32 %v4062_v28, %v3819_v31  ;;  %v4469_v28 = vld [vmem:[%s6291_s8 + $0x8] ss:$28 sps:$4 sm:$0xff]   ;;  %v4475_v30 = vld [vmem:[%s6291_s8 + $0x40] ss:$28 sps:$4 sm:$0xff]  }
 0x278   :  { %v4483_v31 = vld [vmem:[%s6291_s8 + $0x7c] ss:$28 sps:$4 sm:$0xff]  }
 0x282   :  { %v1877_v33 = vpop.f32.mrb[8].mxu1 }
 0x283   :  { %v5619_v34 = vadd.f32 %v1877_v33, %v1838_v32  ;;  %v1879_v35 = vpop.f32.mrb[9].mxu1  ;;  %v4481_v32 = vld [vmem:[%s6291_s8 + $0x78] ss:$28 sps:$4 sm:$0xff]  }
 0x284   :  { %v1880_v36 = vpop.f32.mrb[10].mxu1  ;;  %v4489_v33 = vld [vmem:[%s6291_s8 + $0xb4] ss:$28 sps:$4 sm:$0xff]   ;;  %v4495_v35 = vld [vmem:[%s6291_s8 + $0xec] ss:$28 sps:$4 sm:$0xff]  }
 0x285   :  { %v1884_v37 = vmul.f32 0.5, %v5619_v34  ;;  %v1881_v38 = vpop.f32.mrb[11].mxu1  ;;  %3574 = vst.msk [vmem:[#allocation4] sm:$0xff] %vm1952_vm1, %v5619_v34  ;;  %v4493_v36 = vld [vmem:[%s6291_s8 + $0xe8] ss:$28 sps:$4 sm:$0xff]  }
 0x286   :  { %v4499_v38 = vld [vmem:[%s6291_s8 + $0x120] ss:$28 sps:$4 sm:$0xff]  }
 0x287   :  { %v1885_v40 = vmul.f32 1.442695, %v1884_v37  ;;  %v4501_v37 = vld [vmem:[%s6291_s8 + $0x124] ss:$28 sps:$4 sm:$0xff]  }
 0x289   :  { %4716 = vpow2.f32 %v1885_v40  ;;  %v4505_v40 = vld [vmem:[%s6291_s8 + $0x158] ss:$28 sps:$4 sm:$0xff]  }
 0x293   :  { %v4717_v44 = vpop.eup %4716 }
 0x294   :  { %1888 = vrot.lane.b32.xlu0 %v4717_v44, %s4817_s30  ;;  %v4525_v44 = vld [vmem:[%s6291_s8 + $0x204] ss:$28 sps:$4 sm:$0xff]  }
 0x298   :  { %3576 = vrot.lane.b32.xlu0 %v5619_v34, %s4817_s30 }
 0x306   :  { %v1889_v17 = vpop.permute.xlu0 %1888 }
 0x307   :  { %v1891_v18 = vmul.f32 %v1889_v17, %v1883_v16 }
 0x309   :  { %v1892_v20 = vadd.f32 %v1891_v18, %v5619_v34  ;;  %v4487_v34 = vld [vmem:[%s6291_s8 + $0xb0] ss:$28 sps:$4 sm:$0xff]  }
 0x30a   :  { %v3577_v21 = vpop.permute.xlu0 %3576 }
 0x30b   :  { %v1893_v23 = vpack.c.bf16 %v1892_v20, %v1892_v20  ;;  %3579 = vst.msk [vmem:[#allocation6] sm:$0xff] %vm1952_vm1, %v3577_v21  ;;  %v4565_v20 = vld [vmem:[%s6291_s8 + $0x388] ss:$28 sps:$4 sm:$0xff]   ;;  %v1917_v21 = vrot.slane %v5850_v4, %v5604_v11 }
 0x30d   :  { %3855 = vmatmul.mubr.msk.bf16.vlgmr.msra.gmra.mrb[12].mxu1 %vm1952_vm1, %v1893_v23 }
 0x30e   :  { %2011 = vmatpush1.bf16.msra.mxu1 %v4461_v22  ;;  %2042 = vmatprep.mubr.bf16.mxu1 %v4816_v2 }
 0x30f   :  { %3856 = vmatprep.subr.msk.bf16.mxu1 %vm1956_vm2, %v3853_v24  ;;  %v4573_v24 = vld [vmem:[%s6291_s8 + $0x3c4] ss:$28 sps:$4 sm:$0xff]  }
 0x312   :  { %2013 = vmatpush1.bf16.msra.mxu1 %v1964_v26 }
 0x313   :  { %3281 = vmatprep.subr.bf16.mxu1 %v4471_v27 }
 0x315   :  { %3857 = vmatmul.mubr.msk.bf16.vlgmr.msra.gmra.mrb[16].mxu1 %vm1952_vm1, %v1893_v23  ;;  %v4570_v23 = vld [vmem:[%s6291_s8 + $0x3bc] ss:$28 sps:$4 sm:$0xff]  }
 0x316   :  { %3282 = vmatpush1.bf16.msra.mxu1 %v4469_v28 }
 0x317   :  { %3283 = vmatprep.subr.bf16.mxu1 %v4477_v29  ;;  %v4568_v29 = vld [vmem:[%s6291_s8 + $0x3b8] ss:$28 sps:$4 sm:$0xff]  }
 0x31a   :  { %3284 = vmatpush1.bf16.msra.mxu1 %v4475_v30  ;;  %v4571_v30 = vld [vmem:[%s6291_s8 + $0x3c0] ss:$28 sps:$4 sm:$0xff]  }
 0x31b   :  { %3285 = vmatprep.subr.bf16.mxu1 %v4483_v31 }
 0x31e   :  { %3286 = vmatpush1.bf16.msra.mxu1 %v4481_v32  ;;  %v4576_v32 = vld [vmem:[%s6291_s8 + $0x3f4] ss:$28 sps:$4 sm:$0xff]  }
 0x31f   :  { %3287 = vmatprep.subr.bf16.mxu1 %v4489_v33  ;;  %v4579_v33 = vld [vmem:[%s6291_s8 + $0x3fc] ss:$28 sps:$4 sm:$0xff]  }
 0x322   :  { %3288 = vmatpush1.bf16.msra.mxu1 %v4487_v34 }
 0x323   :  { %3289 = vmatprep.subr.bf16.mxu1 %v4495_v35 }
 0x326   :  { %3290 = vmatpush1.bf16.msra.mxu1 %v4493_v36  ;;  %v4574_v36 = vld [vmem:[%s6291_s8 + $0x3f0] ss:$28 sps:$4 sm:$0xff]  }
 0x327   :  { %3291 = vmatprep.subr.bf16.mxu1 %v4501_v37  ;;  %v4577_v37 = vld [vmem:[%s6291_s8 + $0x3f8] ss:$28 sps:$4 sm:$0xff]  }
 0x32a   :  { %3292 = vmatpush1.bf16.msra.mxu1 %v4499_v38  ;;  %v4582_v38 = vld [vmem:[%s6291_s8 + $0x42c] ss:$28 sps:$4 sm:$0xff]  }
 0x32b   :  { %3293 = vmatprep.subr.bf16.mxu1 %v4507_v39  ;;  %v4585_v39 = vld [vmem:[%s6291_s8 + $0x434] ss:$28 sps:$4 sm:$0xff]  }
 0x32e   :  { %3294 = vmatpush1.bf16.msra.mxu1 %v4505_v40  ;;  %v4580_v40 = vld [vmem:[%s6291_s8 + $0x428] ss:$28 sps:$4 sm:$0xff]  }
 0x32f   :  { %3295 = vmatprep.subr.bf16.mxu1 %v4513_v41  ;;  %v4583_v41 = vld [vmem:[%s6291_s8 + $0x430] ss:$28 sps:$4 sm:$0xff]  }
 0x332   :  { %3296 = vmatpush1.bf16.msra.mxu1 %v4511_v42  ;;  %v4588_v42 = vld [vmem:[%s6291_s8 + $0x464] ss:$28 sps:$4 sm:$0xff]  }
 0x333   :  { %3297 = vmatprep.subr.bf16.mxu1 %v4519_v7  ;;  %v4591_v7 = vld [vmem:[%s6291_s8 + $0x46c] ss:$28 sps:$4 sm:$0xff]  }
 0x336   :  { %3298 = vmatpush1.bf16.msra.mxu1 %v4517_v43  ;;  %v4586_v43 = vld [vmem:[%s6291_s8 + $0x460] ss:$28 sps:$4 sm:$0xff]  }
 0x337   :  { %3299 = vmatprep.subr.bf16.mxu1 %v4525_v44  ;;  %v4589_v44 = vld [vmem:[%s6291_s8 + $0x468] ss:$28 sps:$4 sm:$0xff]  }
 0x33a   :  { %3300 = vmatpush1.bf16.msra.mxu1 %v4523_v45  ;;  %v4594_v45 = vld [vmem:[%s6291_s8 + $0x49c] ss:$28 sps:$4 sm:$0xff]  }
 0x33b   :  { %3301 = vmatprep.subr.bf16.mxu1 %v4531_v46  ;;  %v4597_v46 = vld [vmem:[%s6291_s8 + $0x4a4] ss:$28 sps:$4 sm:$0xff]  }
 0x33e   :  { %3302 = vmatpush1.bf16.msra.mxu1 %v4529_v47  ;;  %v4592_v47 = vld [vmem:[%s6291_s8 + $0x498] ss:$28 sps:$4 sm:$0xff]  }
 0x33f   :  { %3303 = vmatprep.subr.bf16.mxu1 %v4537_v48  ;;  %v4595_v48 = vld [vmem:[%s6291_s8 + $0x4a0] ss:$28 sps:$4 sm:$0xff]  }
 0x342   :  { %3304 = vmatpush1.bf16.msra.mxu1 %v4535_v49  ;;  %v4600_v49 = vld [vmem:[%s6291_s8 + $0x4d4] ss:$28 sps:$4 sm:$0xff]  }
 0x343   :  { %3305 = vmatprep.subr.bf16.mxu1 %v4543_v50  ;;  %v4603_v50 = vld [vmem:[%s6291_s8 + $0x4dc] ss:$28 sps:$4 sm:$0xff]  }
 0x346   :  { %3306 = vmatpush1.bf16.msra.mxu1 %v4541_v51  ;;  %v4598_v51 = vld [vmem:[%s6291_s8 + $0x4d0] ss:$28 sps:$4 sm:$0xff]  }
 0x347   :  { %3307 = vmatprep.subr.bf16.mxu1 %v4549_v52  ;;  %v4601_v52 = vld [vmem:[%s6291_s8 + $0x4d8] ss:$28 sps:$4 sm:$0xff]  }
 0x34a   :  { %3308 = vmatpush1.bf16.msra.mxu1 %v4547_v53  ;;  %v1913_v53 = vrot.slane %v5850_v4, %v5601_v10  ;;  %v4618_v4 = vld [vmem:[%s6291_s8 + $0x14] ss:$28 sps:$4 sm:$0xff]  }
 0x34b   :  { %3309 = vmatprep.subr.bf16.mxu1 %v4555_v58  ;;  %v4609_v58 = vld [vmem:[%s6291_s8 + $0x514] ss:$28 sps:$4 sm:$0xff]  }
 0x34e   :  { %3310 = vmatpush1.bf16.msra.mxu1 %v4553_v60  ;;  %v4607_v60 = vld [vmem:[%s6291_s8 + $0x510] ss:$28 sps:$4 sm:$0xff]  }
 0x34f   :  { %3311 = vmatprep.subr.bf16.mxu1 %v4561_v62  ;;  %v4612_v62 = vld [vmem:[%s6291_s8 + $0x544] ss:$28 sps:$4 sm:$0xff]  }
 0x352   :  { %3312 = vmatpush1.bf16.msra.mxu1 %v4559_v0  ;;  %v4610_v0 = vld [vmem:[%s6291_s8 + $0x540] ss:$28 sps:$4 sm:$0xff]  }
 0x353   :  { %3322 = vmatprep.subr.bf16.mxu1 %v4567_v3 }
 0x3e0   :  { %v2003_v8 = vpop.f32.mrb[12].mxu1 }
 0x3e1   :  { %v2004_v9 = vadd.f32 %v2003_v8, %v1905_v5  ;;  %v2005_v12 = vpop.f32.mrb[13].mxu1  ;;  %v4619_v5 = vld [vmem:[%s6291_s8 + $0x1d8] ss:$28 sps:$4 sm:$0xff]  }
 0x3e2   :  { %v2006_v13 = vadd.f32 %v2005_v12, %v1909_v6  ;;  %v2007_v14 = vpop.f32.mrb[14].mxu1  ;;  %v4616_v6 = vld [vmem:[%s6291_s8 + $0x10] ss:$28 sps:$4 sm:$0xff]  }
 0x3e3   :  { %v2051_v15 = vmax.f32 %v2004_v9, 0.0  ;;  %v2008_v16 = vpop.f32.mrb[15].mxu1  ;;  %v4620_v9 = vld [vmem:[%s6291_s8 + $0x18] ss:$28 sps:$4 sm:$0xff]   ;;  %v4623_v12 = vld [vmem:[%s6291_s8 + $0x4c] ss:$28 sps:$4 sm:$0xff]  }
 0x3e4   :  { %v2052_v17 = vmax.f32 %v2006_v13, 0.0  ;;  %v4624_v13 = vld [vmem:[%s6291_s8 + $0x210] ss:$28 sps:$4 sm:$0xff]   ;;  %v4621_v14 = vld [vmem:[%s6291_s8 + $0x48] ss:$28 sps:$4 sm:$0xff]  }
 0x3e5   :  { %v5866_v22 = vpack.c.bf16 %v2051_v15, %v2051_v15  ;;  %v4625_v15 = vld [vmem:[%s6291_s8 + $0x50] ss:$28 sps:$4 sm:$0xff]   ;;  %v4628_v16 = vld [vmem:[%s6291_s8 + $0x84] ss:$28 sps:$4 sm:$0xff]  }
 0x3e6   :  { %v5856_v18 = vpack.c.bf16 %v2052_v17, %v2052_v17  ;;  %v4629_v17 = vld [vmem:[%s6291_s8 + $0x248] ss:$28 sps:$4 sm:$0xff]  }
 0x3e8   :  { %v5874_v25 = vpop.f32.mrb[16].mxu1  ;;  %3231 = vmatprep.mubr.bf16.mxu0 %v5856_v18  ;;  %3313 = vmatprep.mubr.bf16.mxu1 %v5856_v18 }
 0x3e9   :  { %v2046_v26 = vpop.f32.mrb[17].mxu1  ;;  %3232 = vmatmul.mubr.bf16.vlgmr.msra.gmra.mrb[8].mxu0 %v5866_v22  ;;  %3314 = vmatmul.mubr.bf16.vlgmr.msra.gmra.mrb[20].mxu1 %v5866_v22  ;;  %v2045_v61 = vadd.f32 %v5874_v25, %v1913_v53  ;;  %v4638_v25 = vld [vmem:[%s6291_s8 + $0xf4] ss:$28 sps:$4 sm:$0xff]  }
 0x3ea   :  { %v2047_v27 = vadd.f32 %v2046_v26, %v1917_v21  ;;  %3241 = vmatpush1.bf16.msra.mxu0 %v4562_v19  ;;  %3323 = vmatpush1.bf16.msra.mxu1 %v4565_v20  ;;  %v2048_v28 = vpop.f32.mrb[18].mxu1  ;;  %v4626_v19 = vld [vmem:[%s6291_s8 + $0x80] ss:$28 sps:$4 sm:$0xff]   ;;  %v4639_v26 = vld [vmem:[%s6291_s8 + $0x2b8] ss:$28 sps:$4 sm:$0xff]  }
 0x3eb   :  { %v2049_v31 = vpop.f32.mrb[19].mxu1  ;;  %3242 = vmatprep.subr.bf16.mxu0 %v4570_v23  ;;  %3324 = vmatprep.subr.bf16.mxu1 %v4573_v24  ;;  %v2053_v3 = vmax.f32 %v2045_v61, 0.0  ;;  %v4633_v20 = vld [vmem:[%s6291_s8 + $0xbc] ss:$28 sps:$4 sm:$0xff]   ;;  %v4674_v53 = vld [vmem:[%s6291_s8 + $0x2b4] ss:$28 sps:$4 sm:$0xff]  }
 0x3ec   :  { %v2054_v34 = vmax.f32 %v2047_v27, 0.0  ;;  %v4634_v21 = vld [vmem:[%s6291_s8 + $0x280] ss:$28 sps:$4 sm:$0xff]   ;;  %v4631_v23 = vld [vmem:[%s6291_s8 + $0xb8] ss:$28 sps:$4 sm:$0xff]  }
 0x3ed   :  { %v5988_v8 = vpack.c.bf16 %v2053_v3, %v2053_v3  ;;  %v4635_v24 = vld [vmem:[%s6291_s8 + $0xc0] ss:$28 sps:$4 sm:$0xff]   ;;  %v4636_v27 = vld [vmem:[%s6291_s8 + $0xf0] ss:$28 sps:$4 sm:$0xff]   ;;  %v4640_v28 = vld [vmem:[%s6291_s8 + $0xf8] ss:$28 sps:$4 sm:$0xff]  }
 0x3ee   :  { %v5892_v35 = vpack.c.bf16 %v2054_v34, %v2054_v34  ;;  %3243 = vmatpush1.bf16.msra.mxu0 %v4568_v29  ;;  %3325 = vmatpush1.bf16.msra.mxu1 %v4571_v30  ;;  %v4643_v29 = vld [vmem:[%s6291_s8 + $0x12c] ss:$28 sps:$4 sm:$0xff]   ;;  %v4684_v3 = vld [vmem:[%s6291_s8 + $0x358] ss:$28 sps:$4 sm:$0xff]  }
 0x3ef   :  { %3244 = vmatprep.subr.bf16.mxu0 %v4576_v32  ;;  %3326 = vmatprep.subr.bf16.mxu1 %v4579_v33  ;;  %v4644_v30 = vld [vmem:[%s6291_s8 + $0x2f0] ss:$28 sps:$4 sm:$0xff]   ;;  %v4641_v31 = vld [vmem:[%s6291_s8 + $0x128] ss:$28 sps:$4 sm:$0xff]  }
 0x3f0   :  { %4033 = vmatprep.mubr.msk.bf16.mxu0 %vm1253_vm0, %v5892_v35  ;;  %4034 = vmatprep.mubr.msk.bf16.mxu1 %vm1253_vm0, %v5892_v35  ;;  %v4645_v32 = vld [vmem:[%s6291_s8 + $0x130] ss:$28 sps:$4 sm:$0xff]   ;;  %v4648_v33 = vld [vmem:[%s6291_s8 + $0x164] ss:$28 sps:$4 sm:$0xff]  }
 0x3f1   :  { %v4649_v34 = vld [vmem:[%s6291_s8 + $0x328] ss:$28 sps:$4 sm:$0xff]   ;;  %v4679_v61 = vld [vmem:[%s6291_s8 + $0x4b0] ss:$28 sps:$4 sm:$0xff]  }
 0x3f2   :  { %3245 = vmatpush1.bf16.msra.mxu0 %v4574_v36  ;;  %3327 = vmatpush1.bf16.msra.mxu1 %v4577_v37  ;;  %v4646_v36 = vld [vmem:[%s6291_s8 + $0x160] ss:$28 sps:$4 sm:$0xff]   ;;  %v4650_v37 = vld [vmem:[%s6291_s8 + $0x168] ss:$28 sps:$4 sm:$0xff]  }
 0x3f3   :  { %3246 = vmatprep.subr.bf16.mxu0 %v4582_v38  ;;  %3328 = vmatprep.subr.bf16.mxu1 %v4585_v39  ;;  %v4653_v38 = vld [vmem:[%s6291_s8 + $0x19c] ss:$28 sps:$4 sm:$0xff]  }
 0x3f4   :  { %v4654_v39 = vld [vmem:[%s6291_s8 + $0x360] ss:$28 sps:$4 sm:$0xff]  }
 0x3f6   :  { %3247 = vmatpush1.bf16.msra.mxu0 %v4580_v40  ;;  %3329 = vmatpush1.bf16.msra.mxu1 %v4583_v41  ;;  %v4651_v40 = vld [vmem:[%s6291_s8 + $0x198] ss:$28 sps:$4 sm:$0xff]   ;;  %v4655_v41 = vld [vmem:[%s6291_s8 + $0x1a0] ss:$28 sps:$4 sm:$0xff]  }
 0x3f7   :  { %3248 = vmatprep.subr.bf16.mxu0 %v4588_v42  ;;  %3330 = vmatprep.subr.bf16.mxu1 %v4591_v7  ;;  %v4658_v42 = vld [vmem:[%s6291_s8 + $0x1d4] ss:$28 sps:$4 sm:$0xff]  }
 0x3f8   :  { %v4656_v7 = vld [vmem:[%s6291_s8 + $0x1d0] ss:$28 sps:$4 sm:$0xff]  }
 0x3fa   :  { %3249 = vmatpush1.bf16.msra.mxu0 %v4586_v43  ;;  %3331 = vmatpush1.bf16.msra.mxu1 %v4589_v44  ;;  %v4659_v43 = vld [vmem:[%s6291_s8 + $0x398] ss:$28 sps:$4 sm:$0xff]   ;;  %v4662_v44 = vld [vmem:[%s6291_s8 + $0x20c] ss:$28 sps:$4 sm:$0xff]  }
 0x3fb   :  { %3250 = vmatprep.subr.bf16.mxu0 %v4594_v45  ;;  %3332 = vmatprep.subr.bf16.mxu1 %v4597_v46  ;;  %v4660_v45 = vld [vmem:[%s6291_s8 + $0x208] ss:$28 sps:$4 sm:$0xff]   ;;  %v4663_v46 = vld [vmem:[%s6291_s8 + $0x3d0] ss:$28 sps:$4 sm:$0xff]  }
 0x3fe   :  { %3251 = vmatpush1.bf16.msra.mxu0 %v4592_v47  ;;  %3333 = vmatpush1.bf16.msra.mxu1 %v4595_v48  ;;  %v4666_v47 = vld [vmem:[%s6291_s8 + $0x244] ss:$28 sps:$4 sm:$0xff]  }
 0x3ff   :  { %3252 = vmatprep.subr.bf16.mxu0 %v4600_v49  ;;  %3334 = vmatprep.subr.bf16.mxu1 %v4603_v50  ;;  %v4664_v48 = vld [vmem:[%s6291_s8 + $0x240] ss:$28 sps:$4 sm:$0xff]   ;;  %v4667_v49 = vld [vmem:[%s6291_s8 + $0x408] ss:$28 sps:$4 sm:$0xff]  }
 0x400   :  { %v4670_v50 = vld [vmem:[%s6291_s8 + $0x27c] ss:$28 sps:$4 sm:$0xff]  }
 0x402   :  { %3253 = vmatpush1.bf16.msra.mxu0 %v4598_v51  ;;  %3335 = vmatpush1.bf16.msra.mxu1 %v4601_v52  ;;  %v4668_v51 = vld [vmem:[%s6291_s8 + $0x278] ss:$28 sps:$4 sm:$0xff]   ;;  %v4671_v52 = vld [vmem:[%s6291_s8 + $0x440] ss:$28 sps:$4 sm:$0xff]  }
 0x403   :  { %3254 = vmatprep.subr.bf16.mxu0 %v4606_v56  ;;  %3336 = vmatprep.subr.bf16.mxu1 %v4609_v58  ;;  %v4672_v56 = vld [vmem:[%s6291_s8 + $0x2b0] ss:$28 sps:$4 sm:$0xff]   ;;  %v4675_v58 = vld [vmem:[%s6291_s8 + $0x478] ss:$28 sps:$4 sm:$0xff]  }
 0x406   :  { %3255 = vmatpush1.bf16.msra.mxu0 %v4604_v59  ;;  %3337 = vmatpush1.bf16.msra.mxu1 %v4607_v60  ;;  %v4678_v59 = vld [vmem:[%s6291_s8 + $0x2ec] ss:$28 sps:$4 sm:$0xff]  }
 0x407   :  { %3256 = vmatprep.subr.bf16.mxu0 %v4612_v62  ;;  %3338 = vmatprep.subr.bf16.mxu1 %v4615_v63  ;;  %v4676_v60 = vld [vmem:[%s6291_s8 + $0x2e8] ss:$28 sps:$4 sm:$0xff]   ;;  %v4680_v63 = vld [vmem:[%s6291_s8 + $0x320] ss:$28 sps:$4 sm:$0xff]  }
 0x408   :  { %v4682_v62 = vld [vmem:[%s6291_s8 + $0x324] ss:$28 sps:$4 sm:$0xff]  }
 0x40a   :  { %3257 = vmatpush1.bf16.msra.mxu0 %v4610_v0  ;;  %3339 = vmatpush1.bf16.msra.mxu1 %v4613_v1  ;;  %v4683_v0 = vld [vmem:[%s6291_s8 + $0x4e8] ss:$28 sps:$4 sm:$0xff]   ;;  %v4686_v1 = vld [vmem:[%s6291_s8 + $0x35c] ss:$28 sps:$4 sm:$0xff]  }
 0x40b   :  { %3363 = vmatprep.subr.bf16.mxu0 %v4618_v4  ;;  %4066 = vmatprep.subr.bf16.mxu1 %v4619_v5  ;;  %v4687_v4 = vld [vmem:[%s6291_s8 + $0x520] ss:$28 sps:$4 sm:$0xff]   ;;  %v4690_v5 = vld [vmem:[%s6291_s8 + $0x394] ss:$28 sps:$4 sm:$0xff]  }
 0x40d   :  { %3273 = vmatmul.mubr.bf16.vlgmr.msra.gmra.mrb[8].mxu0 %v5988_v8  ;;  %3355 = vmatmul.mubr.bf16.vlgmr.msra.gmra.mrb[20].mxu1 %v5988_v8 }
 0x40e   :  { %3364 = vmatpush1.bf16.msra.mxu0 %v4616_v6  ;;  %3395 = vmatprep.mubr.bf16.mxu0 %v5856_v18  ;;  %v4688_v6 = vld [vmem:[%s6291_s8 + $0x390] ss:$28 sps:$4 sm:$0xff]  }
 0x40f   :  { %4067 = vmatpush3.bf16.msra.mxu1 %v4620_v9  ;;  %3477 = vmatprep.mubr.bf16.mxu1 %v5856_v18  ;;  %v4630_v18 = vld [vmem:[%s6291_s8 + $0x88] ss:$28 sps:$4 sm:$0xff]   ;;  %v4691_v9 = vld [vmem:[%s6291_s8 + $0x558] ss:$28 sps:$4 sm:$0xff]  }
 0x410   :  { %3365 = vmatprep.subr.bf16.mxu0 %v4623_v12  ;;  %4068 = vmatprep.subr.bf16.mxu1 %v4624_v13  ;;  %v4694_v12 = vld [vmem:[%s6291_s8 + $0x3cc] ss:$28 sps:$4 sm:$0xff]  }
 0x411   :  { %v4692_v13 = vld [vmem:[%s6291_s8 + $0x3c8] ss:$28 sps:$4 sm:$0xff]  }
 0x412   :  { %3366 = vmatpush1.bf16.msra.mxu0 %v4621_v14  ;;  %v4697_v14 = vld [vmem:[%s6291_s8 + $0x404] ss:$28 sps:$4 sm:$0xff]  }
 0x413   :  { %4069 = vmatpush3.bf16.msra.mxu1 %v4625_v15  ;;  %3367 = vmatprep.subr.bf16.mxu0 %v4628_v16  ;;  %v4703_v15 = vld [vmem:[%s6291_s8 + $0x474] ss:$28 sps:$4 sm:$0xff]  }
 0x414   :  { %4070 = vmatprep.subr.bf16.mxu1 %v4629_v17  ;;  %v4701_v16 = vld [vmem:[%s6291_s8 + $0x470] ss:$28 sps:$4 sm:$0xff]  }
 0x415   :  { %v4706_v17 = vld [vmem:[%s6291_s8 + $0x4ac] ss:$28 sps:$4 sm:$0xff]  }
 0x416   :  { %3368 = vmatpush1.bf16.msra.mxu0 %v4626_v19  ;;  %v4704_v19 = vld [vmem:[%s6291_s8 + $0x4a8] ss:$28 sps:$4 sm:$0xff]  }
 0x417   :  { %4071 = vmatpush3.bf16.msra.mxu1 %v4630_v18  ;;  %3369 = vmatprep.subr.bf16.mxu0 %v4633_v20  ;;  %v4709_v18 = vld [vmem:[%s6291_s8 + $0x4e4] ss:$28 sps:$4 sm:$0xff]  }
 0x418   :  { %4072 = vmatprep.subr.bf16.mxu1 %v4634_v21  ;;  %v4707_v20 = vld [vmem:[%s6291_s8 + $0x4e0] ss:$28 sps:$4 sm:$0xff]  }
 0x419   :  { %v4712_v21 = vld [vmem:[%s6291_s8 + $0x51c] ss:$28 sps:$4 sm:$0xff]  }
 0x41a   :  { %3370 = vmatpush1.bf16.msra.mxu0 %v4631_v23  ;;  %v4710_v23 = vld [vmem:[%s6291_s8 + $0x518] ss:$28 sps:$4 sm:$0xff]  }
 0x41b   :  { %4073 = vmatpush3.bf16.msra.mxu1 %v4635_v24  ;;  %3371 = vmatprep.subr.bf16.mxu0 %v4638_v25  ;;  %v4715_v24 = vld [vmem:[%s6291_s8 + $0x554] ss:$28 sps:$4 sm:$0xff]  }
 0x41c   :  { %4074 = vmatprep.subr.bf16.mxu1 %v4639_v26  ;;  %v4713_v25 = vld [vmem:[%s6291_s8 + $0x550] ss:$28 sps:$4 sm:$0xff]   ;;  %v6230_v26 = vld [vmem:[%s6292_s9] sm:$0x7f] }
 0x41e   :  { %3372 = vmatpush1.bf16.msra.mxu0 %v4636_v27  ;;  %v2264_v27 = vrot.slane %v6230_v26, %v5590_v55 }
 0x41f   :  { %4075 = vmatpush3.bf16.msra.mxu1 %v4640_v28  ;;  %3373 = vmatprep.subr.bf16.mxu0 %v4643_v29  ;;  %v2272_v28 = vrot.slane %v6230_v26, %v5601_v10  ;;  %v2268_v29 = vrot.slane %v6230_v26, %v5596_v57 }
 0x420   :  { %4076 = vmatprep.subr.bf16.mxu1 %v4644_v30  ;;  %v2276_v30 = vrot.slane %v6230_v26, %v5604_v11 }
 0x422   :  { %3374 = vmatpush1.bf16.msra.mxu0 %v4641_v31 }
 0x423   :  { %4077 = vmatpush3.bf16.msra.mxu1 %v4645_v32  ;;  %3375 = vmatprep.subr.bf16.mxu0 %v4648_v33 }
 0x424   :  { %4078 = vmatprep.subr.bf16.mxu1 %v4649_v34 }
 0x426   :  { %3376 = vmatpush1.bf16.msra.mxu0 %v4646_v36 }
 0x427   :  { %4079 = vmatpush3.bf16.msra.mxu1 %v4650_v37  ;;  %3377 = vmatprep.subr.bf16.mxu0 %v4653_v38 }
 0x428   :  { %4080 = vmatprep.subr.bf16.mxu1 %v4654_v39 }
 0x42a   :  { %3378 = vmatpush1.bf16.msra.mxu0 %v4651_v40 }
 0x42b   :  { %4081 = vmatpush3.bf16.msra.mxu1 %v4655_v41  ;;  %3379 = vmatprep.subr.bf16.mxu0 %v4658_v42 }
 0x42c   :  { %3485 = vmatprep.subr.bf16.mxu1 %v4816_v2 }
 0x42e   :  { %3478 = vmatmul.mubr.bf16.vlgmr.msra.gmra.mrb[24].mxu1 %v5866_v22  ;;  %3380 = vmatpush1.bf16.msra.mxu0 %v4656_v7 }
 0x42f   :  { %3486 = vmatpush1.bf16.msra.mxu1 %v4659_v43  ;;  %4036 = vmatprep.mubr.msk.bf16.mxu1 %vm1253_vm0, %v5892_v35 }
 0x430   :  { %3381 = vmatprep.subr.bf16.mxu0 %v4662_v44  ;;  %3487 = vmatprep.subr.bf16.mxu1 %v4816_v2 }
 0x432   :  { %3382 = vmatpush1.bf16.msra.mxu0 %v4660_v45 }
 0x433   :  { %3488 = vmatpush1.bf16.msra.mxu1 %v4663_v46  ;;  %3383 = vmatprep.subr.bf16.mxu0 %v4666_v47 }
 0x434   :  { %3489 = vmatprep.subr.bf16.mxu1 %v4816_v2 }
 0x436   :  { %3384 = vmatpush1.bf16.msra.mxu0 %v4664_v48 }
 0x437   :  { %3490 = vmatpush1.bf16.msra.mxu1 %v4667_v49  ;;  %3385 = vmatprep.subr.bf16.mxu0 %v4670_v50 }
 0x438   :  { %3491 = vmatprep.subr.bf16.mxu1 %v4816_v2 }
 0x43a   :  { %3386 = vmatpush1.bf16.msra.mxu0 %v4668_v51 }
 0x43b   :  { %3492 = vmatpush1.bf16.msra.mxu1 %v4671_v52  ;;  %3387 = vmatprep.subr.bf16.mxu0 %v4674_v53 }
 0x43c   :  { %3493 = vmatprep.subr.bf16.mxu1 %v4816_v2 }
 0x43e   :  { %3388 = vmatpush1.bf16.msra.mxu0 %v4672_v56 }
 0x43f   :  { %3494 = vmatpush1.bf16.msra.mxu1 %v4675_v58  ;;  %3389 = vmatprep.subr.bf16.mxu0 %v4678_v59 }
 0x440   :  { %3495 = vmatprep.subr.bf16.mxu1 %v4816_v2 }
 0x442   :  { %3390 = vmatpush1.bf16.msra.mxu0 %v4676_v60 }
 0x443   :  { %3496 = vmatpush1.bf16.msra.mxu1 %v4679_v61  ;;  %3391 = vmatprep.subr.bf16.mxu0 %v4682_v62 }
 0x444   :  { %3497 = vmatprep.subr.bf16.mxu1 %v4816_v2 }
 0x446   :  { %3392 = vmatpush1.bf16.msra.mxu0 %v4680_v63 }
 0x447   :  { %3498 = vmatpush1.bf16.msra.mxu1 %v4683_v0  ;;  %3393 = vmatprep.subr.bf16.mxu0 %v4686_v1 }
 0x448   :  { %3499 = vmatprep.subr.bf16.mxu1 %v4816_v2 }
 0x44a   :  { %3394 = vmatpush1.bf16.msra.mxu0 %v4684_v3 }
 0x44b   :  { %3500 = vmatpush1.bf16.msra.mxu1 %v4687_v4  ;;  %3404 = vmatprep.subr.bf16.mxu0 %v4690_v5 }
 0x44c   :  { %3501 = vmatprep.subr.bf16.mxu1 %v4816_v2  ;;  %v4695_v2 = vld [vmem:[%s6291_s8 + $0x400] ss:$28 sps:$4 sm:$0xff]  }
 0x44d   :  { %3396 = vmatmul.mubr.bf16.vlgmr.msra.gmra.mrb[12].mxu0 %v5866_v22  ;;  %v4700_v22 = vld [vmem:[%s6291_s8 + $0x43c] ss:$28 sps:$4 sm:$0xff]  }
 0x44e   :  { %3405 = vmatpush1.bf16.msra.mxu0 %v4688_v6  ;;  %4035 = vmatprep.mubr.msk.bf16.mxu0 %vm1253_vm0, %v5892_v35  ;;  %v4698_v35 = vld [vmem:[%s6291_s8 + $0x438] ss:$28 sps:$4 sm:$0xff]   ;;  %s4818_s8 = smov [#allocation4]  }
 0x44f   :  { %3502 = vmatpush1.bf16.msra.mxu1 %v4691_v9  ;;  %3406 = vmatprep.subr.bf16.mxu0 %v4694_v12  ;;  %s3596_s9 = sshll.u32 %s4818_s8, 4  ;;  %s3597_s9 = int_to_ptr.vmem [resolvable:$true] %s3596_s9 }
 0x450   :  { %s4746_s17 = scalar_lea.vmem %s3597_s9, 128  ;;  %p4751_p1 = scmp.lt.s32.totalorder %s3597_s9, %s3597_s9 }
 0x451   :  { %p4747_p0 = scmp.ne.s32.totalorder %s3597_s9, %s4746_s17  ;;  %p4752_p2 = scmp.lt.s32.totalorder %s4746_s17, %s4746_s17 }
 0x452   :  { %3518 = vmatmul.mubr.bf16.vlgmr.msra.gmra.mrb[28].mxu1 %v5988_v8  ;;  %3407 = vmatpush1.bf16.msra.mxu0 %v4692_v13 }
 0x453   :  { %3408 = vmatprep.subr.bf16.mxu0 %v4697_v14  ;;  %p4753_p3 = por %p4752_p2, %p4751_p1 }
 0x455   :  { %p4754_p4 = pnand %p4753_p3, %p4747_p0 }
 0x456   :  { %3409 = vmatpush1.bf16.msra.mxu0 %v4695_v2 }
 0x457   :  { %3410 = vmatprep.subr.bf16.mxu0 %v4700_v22 }
 0x45a   :  { %3411 = vmatpush1.bf16.msra.mxu0 %v4698_v35 }
 0x45b   :  { %3412 = vmatprep.subr.bf16.mxu0 %v4703_v15 }
 0x45e   :  { %3413 = vmatpush1.bf16.msra.mxu0 %v4701_v16 }
 0x45f   :  { %3414 = vmatprep.subr.bf16.mxu0 %v4706_v17 }
 0x462   :  { %3415 = vmatpush1.bf16.msra.mxu0 %v4704_v19 }
 0x463   :  { %3416 = vmatprep.subr.bf16.mxu0 %v4709_v18 }
 0x466   :  { %3417 = vmatpush1.bf16.msra.mxu0 %v4707_v20 }
 0x467   :  { %3418 = vmatprep.subr.bf16.mxu0 %v4712_v21 }
 0x46a   :  { %3419 = vmatpush1.bf16.msra.mxu0 %v4710_v23 }
 0x46b   :  { %3420 = vmatprep.subr.bf16.mxu0 %v4715_v24 }
 0x46e   :  { %3421 = vmatpush1.bf16.msra.mxu0 %v4713_v25 }
 0x471   :  { %3437 = vmatmul.mubr.bf16.vlgmr.msra.gmra.mrb[12].mxu0 %v5988_v8 }
 0x4e0   :  { %v3274_v31 = vpop.f32.mrb[8].mxu0  ;;  %v3356_v32 = vpop.f32.mrb[20].mxu1 }
 0x4e1   :  { %v4094_v8 = vadd.f32 %v3274_v31, %v2264_v27  ;;  %v4096_v33 = vadd.f32 %v3356_v32, %v2272_v28  ;;  %v3276_v34 = vpop.f32.mrb[9].mxu0  ;;  %v3358_v36 = vpop.f32.mrb[21].mxu1 }
 0x4e2   :  { %v4095_v37 = vadd.f32 %v3276_v34, %v2268_v29  ;;  %v4097_v38 = vadd.f32 %v3358_v36, %v2276_v30  ;;  %v3278_v39 = vpop.f32.mrb[10].mxu0  ;;  %v3360_v40 = vpop.f32.mrb[22].mxu1 }
 0x4e3   :  { %v4037_v55 = vmul.f32 -1.442695, %v4094_v8  ;;  %v4039_v10 = vmul.f32 -1.442695, %v4096_v33  ;;  %v3279_v41 = vpop.f32.mrb[11].mxu0  ;;  %v3361_v42 = vpop.f32.mrb[23].mxu1 }
 0x4e4   :  { %v4038_v57 = vmul.f32 -1.442695, %v4095_v37  ;;  %v4040_v7 = vmul.f32 -1.442695, %v4097_v38 }
 0x4e5   :  { %4757 = shalt.err (!%p4754_p4)
}
 0x4e6   :  { %s4758_s20 = scalar_lea.hbm %s6294_s11, 128 }
 0x4e7   :  { %p4759_p5 = scmp.ne.s32.totalorder %s6294_s11, %s4758_s20  ;;  %p4762_p6 = scmp.lt.u32.totalorder %s4758_s20, %s6294_s11 }
 0x4e9   :  { %p4764_p7 = pnand %p4762_p6, %p4759_p5 }
 0x4eb   :  { %4767 = shalt.err (!%p4764_p7)
}
 0x4ec   :  { %3599 = dma.vmem_to_hbm [thread:$0]  %s3597_s9, 128, %s6294_s11, [#allocation5]   ;;  %4718 = vpow2.f32 %v4037_v55 }
 0x4ed   :  { %4720 = vpow2.f32 %v4039_v10  ;;  %s4819_s24 = smov [#allocation6]  }
 0x4ee   :  { %s3606_s1 = sshll.u32 %s4819_s24, 4  ;;  %4722 = vpow2.f32 %v4038_v57  ;;  %s3607_s1 = int_to_ptr.vmem [resolvable:$true] %s3606_s1 }
 0x4ef   :  { %4724 = vpow2.f32 %v4040_v7  ;;  %s4768_s25 = scalar_lea.vmem %s3607_s1, 128  ;;  %p4773_p9 = scmp.lt.s32.totalorder %s3607_s1, %s3607_s1 }
 0x4f0   :  { %p4769_p8 = scmp.ne.s32.totalorder %s3607_s1, %s4768_s25  ;;  %p4774_p10 = scmp.lt.s32.totalorder %s4768_s25, %s4768_s25 }
 0x4f2   :  { %p4775_p11 = por %p4774_p10, %p4773_p9 }
 0x4f4   :  { %p4776_p12 = pnand %p4775_p11, %p4769_p8 }
 0x4f6   :  { %4779 = shalt.err (!%p4776_p12)
}
 0x4f7   :  { %s4780_s27 = scalar_lea.hbm %s6295_s12, 128 }
 0x4f8   :  { %p4781_p13 = scmp.ne.s32.totalorder %s6295_s12, %s4780_s27  ;;  %p4784_p0 = scmp.lt.u32.totalorder %s4780_s27, %s6295_s12 }
 0x4fa   :  { %p4786_p1 = pnand %p4784_p0, %p4781_p13 }
 0x4fc   :  { %4789 = shalt.err (!%p4786_p1)
}
 0x4fd   :  { %3609 = dma.vmem_to_hbm [thread:$0]  %s3607_s1, 128, %s6295_s12, [#allocation5]   ;;  %v4719_v11 = vpop.eup %4718  ;;  %v2287_v62 = vsub.s32 6, %v5587_v54  ;;  %v2279_v14 = vsub.s32 4, %v5587_v54  ;;  %v2283_v2 = vsub.s32 5, %v5587_v54 }
 0x4fe   :  { %v4721_v43 = vpop.eup %4720  ;;  %v3546_v44 = vadd.f32 1.0, %v4719_v11  ;;  %s4820_s12 = smov [#allocation2]  }
 0x4ff   :  { %v4723_v45 = vpop.eup %4722  ;;  %v3548_v46 = vadd.f32 1.0, %v4721_v43  ;;  %v2288_v63 = vrot.slane %v6230_v26, %v2287_v62  ;;  %v2280_v35 = vrot.slane %v6230_v26, %v2279_v14  ;;  %v2284_v15 = vrot.slane %v6230_v26, %v2283_v2  ;;  %s3586_s0 = sshll.u32 %s4820_s12, 4  ;;  %s3587_s0 = int_to_ptr.vmem [resolvable:$true] %s3586_s0 }
 0x500   :  { %v4725_v47 = vpop.eup %4724  ;;  %4726 = vrcp.f32 %v3546_v44  ;;  %v3547_v48 = vadd.f32 1.0, %v4723_v45  ;;  %s4790_s13 = scalar_lea.vmem %s3587_s0, 896  ;;  %p4795_p3 = scmp.lt.s32.totalorder %s3587_s0, %s3587_s0 }
 0x501   :  { %4728 = vrcp.f32 %v3548_v46  ;;  %v3549_v49 = vadd.f32 1.0, %v4725_v47  ;;  %v4082_v56 = vpop.f32.mrb[24].mxu1  ;;  %p4791_p2 = scmp.ne.s32.totalorder %s3587_s0, %s4790_s13  ;;  %p4796_p4 = scmp.lt.s32.totalorder %s4790_s13, %s4790_s13 }
 0x502   :  { %4730 = vrcp.f32 %v3547_v48  ;;  %v4083_v58 = vpop.f32.mrb[25].mxu1 }
 0x503   :  { %4732 = vrcp.f32 %v3549_v49  ;;  %v4084_v59 = vadd.f32 %v4083_v58, %v4082_v56  ;;  %v4085_v60 = vpop.f32.mrb[26].mxu1  ;;  %p4797_p5 = por %p4796_p4, %p4795_p3 }
 0x504   :  { %v4086_v61 = vpop.f32.mrb[27].mxu1 }
 0x505   :  { %v3480_v0 = vadd.f32 %v4084_v59, %v2288_v63  ;;  %p4798_p6 = pnand %p4797_p5, %p4791_p2 }
 0x50a   :  { %v4727_v50 = vpop.eup %4726 }
 0x50b   :  { %v4729_v51 = vpop.eup %4728  ;;  %3567 = vst [vmem:[#allocation2] sm:$0xff] %v4727_v50 }
 0x50c   :  { %v4731_v52 = vpop.eup %4730  ;;  %3569 = vst [vmem:[#allocation2 + $0x10] sm:$0xff] %v4729_v51 }
 0x50d   :  { %v4733_v53 = vpop.eup %4732  ;;  %3568 = vst [vmem:[#allocation2 + $0x8] sm:$0xff] %v4731_v52 }
 0x50e   :  { %3570 = vst [vmem:[#allocation2 + $0x18] sm:$0xff] %v4733_v53 }
 0x525   :  { %v3519_v1 = vpop.f32.mrb[28].mxu1 }
 0x526   :  { %v3520_v3 = vadd.f32 %v3519_v1, %v3480_v0  ;;  %v3521_v4 = vpop.f32.mrb[29].mxu1 }
 0x527   :  { %v3522_v5 = vpop.f32.mrb[30].mxu1 }
 0x528   :  { %v4043_v6 = vmul.f32 -1.442695, %v3520_v3  ;;  %v3523_v9 = vpop.f32.mrb[31].mxu1 }
 0x52a   :  { %4734 = vpow2.f32 %v4043_v6 }
 0x534   :  { %v4735_v12 = vpop.eup %4734 }
 0x535   :  { %v3552_v13 = vadd.f32 1.0, %v4735_v12 }
 0x537   :  { %4736 = vrcp.f32 %v3552_v13 }
 0x541   :  { %v4737_v22 = vpop.eup %4736 }
 0x542   :  { %3573 = vst.msk [vmem:[#allocation2 + $0x30] sm:$0xff] %vm1253_vm0, %v4737_v22 }
 0x544   :  { %v3438_v16 = vpop.f32.mrb[12].mxu0 }
 0x545   :  { %v4098_v17 = vadd.f32 %v3438_v16, %v2280_v35  ;;  %v3440_v19 = vpop.f32.mrb[13].mxu0 }
 0x546   :  { %v4099_v18 = vadd.f32 %v3440_v19, %v2284_v15  ;;  %v3442_v20 = vpop.f32.mrb[14].mxu0 }
 0x547   :  { %v4041_v21 = vmul.f32 -1.442695, %v4098_v17  ;;  %v3443_v23 = vpop.f32.mrb[15].mxu0 }
 0x548   :  { %v4042_v24 = vmul.f32 -1.442695, %v4099_v18 }
 0x549   :  { %4738 = vpow2.f32 %v4041_v21 }
 0x54a   :  { %4740 = vpow2.f32 %v4042_v24 }
 0x553   :  { %v4739_v25 = vpop.eup %4738 }
 0x554   :  { %v4741_v27 = vpop.eup %4740  ;;  %v3550_v54 = vadd.f32 1.0, %v4739_v25 }
 0x555   :  { %v3551_v28 = vadd.f32 1.0, %v4741_v27 }
 0x556   :  { %4742 = vrcp.f32 %v3550_v54 }
 0x557   :  { %4744 = vrcp.f32 %v3551_v28 }
 0x560   :  { %v4743_v29 = vpop.eup %4742 }
 0x561   :  { %v4745_v26 = vpop.eup %4744  ;;  %3571 = vst [vmem:[#allocation2 + $0x20] sm:$0xff] %v4743_v29 }
 0x562   :  { %3572 = vst [vmem:[#allocation2 + $0x28] sm:$0xff] %v4745_v26 }
 0x563   :  { %4801 = shalt.err (!%p4798_p6)
}
 0x564   :  { %s4802_s16 = scalar_lea.hbm %s6293_s10, 896 }
 0x565   :  { %p4803_p7 = scmp.ne.s32.totalorder %s6293_s10, %s4802_s16  ;;  %p4806_p8 = scmp.lt.u32.totalorder %s4802_s16, %s6293_s10 }
 0x567   :  { %p4808_p9 = pnand %p4806_p8, %p4803_p7 }
 0x569   :  { %4811 = shalt.err (!%p4808_p9)
}
 0x56a   :  { %3589 = dma.vmem_to_hbm [thread:$0]  %s3587_s0, 896, %s6293_s10, [#allocation3]  }
 0x56b   :  { %4812 = dma.done.wait [#allocation3], 896  }
 0x56c   :  { %4813 = vsyncadd [#allocation3], 4294966400 }
 0x56d   :  { %4814 = dma.done.wait [#allocation5], 256  }
 0x56e   :  { %4815 = vsyncadd [#allocation5], 4294967040 }
 0x56f   :  { %3619 = vsyncpa [#allocation3], 1 }
 0x570   :  { %3620 = vsyncpa [#allocation5], 1 }

</bundles_post_ra>
